<compile_context>
chip_gen: v5e
topology: v5e:2x2
jax: 0.10.0
libtpu: 0.0.40
codegen_flags: <defaults>
</compile_context>

<pallas_src>
import functools

import jax
import jax.numpy as jnp
import numpy as np
from jax.experimental import pallas as pl
from jax.experimental.pallas import tpu as pltpu


# ---------------------------------------------------------------------------
# Pallas kernels
# ---------------------------------------------------------------------------
def _conv_bn_stats_kernel(x_ref, w_ref, scale_ref, bias_ref,
                          y_ref, stat_ref, xp_ref, *, NB, H,
                          apply_input_bnrelu):
    """Fused (BN+ReLU of input) -> 3x3 'same' conv -> BN partial statistics.

    One grid step processes NB batch samples:
      x_ref    : (NB, H, W*Cin)     f32   input rows, channels fastest on lanes
      w_ref    : (3, W*Cin, W*Cout) bf16  banded matmul weights (one slab / ky)
      scale_ref: (1, W*Cin)         f32   folded-BN scale of the input (layer 2)
      bias_ref : (1, W*Cin)         f32   folded-BN bias  of the input (layer 2)
      y_ref    : (NB, H, W*Cout)    f32   raw conv output (pre-BN), lane-dense
      stat_ref : (1, 2, W*Cout)     f32   per-block [sum, sumsq], lane-dense
      xp_ref   : (NB*(H+2), W*Cin)  f32   VMEM halo slab (per-sample zero rows)
    """
    Hp = H + 2
    Mp = NB * Hp
    WCin = x_ref.shape[-1]
    WCout = y_ref.shape[-1]

    # Input prologue (previous layer's folded BN + ReLU), computed once for the
    # whole (NB, H, W*Cin) block in f32 on the VPU (v5e has no bf16 VPU).
    xall = x_ref[...]
    if apply_input_bnrelu:
        xall = jnp.maximum(xall * scale_ref[...] + bias_ref[...], 0.0)

    # Fill the padded slab.  The two halo rows per sample are re-zeroed every
    # step on purpose: scratch is per-TensorCore, so a program_id==0 guard
    # would leave the second core's halo uninitialised under megacore
    # ("parallel") sharding; the cost is only 2*NB tiny row stores.
    zrow = jnp.zeros((1, WCin), xp_ref.dtype)
    for s in range(NB):
        base = s * Hp
        xp_ref[base:base + 1, :] = zrow
        xp_ref[base + H + 1:base + H + 2, :] = zrow
        xp_ref[base + 1:base + H + 1, :] = xall[s]

    # 3x3 conv as three big MXU matmuls over the whole padded slab
    # (M = NB*(H+2)-2 instead of H per sample): bf16 operands, f32 accumulate.
    # Horizontal taps + zero padding along W are folded into the banded slabs,
    # so K = W*Cin; the 2 wasted rows per sample are simply discarded below.
    xp = xp_ref[...].astype(jnp.bfloat16)
    acc = jnp.dot(xp[0:Mp - 2], w_ref[0], preferred_element_type=jnp.float32)
    acc = acc + jnp.dot(xp[1:Mp - 1], w_ref[1],
                        preferred_element_type=jnp.float32)
    acc = acc + jnp.dot(xp[2:Mp], w_ref[2],
                        preferred_element_type=jnp.float32)
    # acc[i] == conv output at padded row i+1; valid rows of sample s are
    # acc[s*Hp : s*Hp + H].

    s_acc = jnp.zeros((1, WCout), jnp.float32)
    q_acc = jnp.zeros((1, WCout), jnp.float32)
    for s in range(NB):
        ys = acc[s * Hp:s * Hp + H, :]
        y_ref[s] = ys                                   # lane-dense store
        s_acc = s_acc + jnp.sum(ys, axis=0, keepdims=True)
        q_acc = q_acc + jnp.sum(ys * ys, axis=0, keepdims=True)
    # Lane-dense (W*Cout) partials; W->C fold happens on these tiny arrays in
    # plain JAX (no M=1 matmuls / masked 8-lane stores inside the kernel).
    stat_ref[0, 0:1, :] = s_acc
    stat_ref[0, 1:2, :] = q_acc


def _bn_relu_kernel(x_ref, scale_ref, bias_ref, o_ref):
    """Folded BatchNorm (per-channel affine) + ReLU, lane-dense, in place."""
    o_ref[...] = jnp.maximum(x_ref[...] * scale_ref[...] + bias_ref[...], 0.0)


# ---------------------------------------------------------------------------
# Wrappers (weight prep + pallas_call plumbing)
# ---------------------------------------------------------------------------
def _prep_conv_weight(w_hwio, W):
    """(3, 3, Cin, Cout) HWIO -> bf16 (3, W*Cin, W*Cout) banded matmul slabs.

    slab[ky, wi*Cin+ci, x*Cout+co] = sum_kx w[ky, kx, ci, co] * [wi == x+kx-1],
    so one (M, W*Cin) @ (W*Cin, W*Cout) matmul per ky implements the 3x3 'same'
    convolution; zero padding along W is implicit in the band structure.
    """
    kh, kw, Cin, Cout = w_hwio.shape
    wi = jnp.arange(W)
    xo = jnp.arange(W)
    kx = jnp.arange(kw)
    sel = (wi[None, :, None] == xo[None, None, :] + kx[:, None, None] - 1)
    sel = sel.astype(w_hwio.dtype)                            # (kw, W, W)
    big = (w_hwio[:, :, None, :, None, :] *
           sel[None, :, :, None, :, None]).sum(axis=1)        # (kh,W,Cin,W,Cout)
    return big.reshape(kh, W * Cin, W * Cout).astype(jnp.bfloat16)


def _pick_nb(N, H, target_rows=128):
    """Samples per grid step: fill the MXU M dimension (~128 rows), but keep
    >=2 grid steps for v7x megacore when halving NB still keeps M >= ~64."""
    nb = max(1, min(N, max(1, target_rows // max(H, 1))))
    while nb > 1 and N % nb:
        nb -= 1
    while (N // nb) < 2 and nb > 1 and (nb // 2) * H >= target_rows // 2 \
            and N % (nb // 2) == 0:
        nb //= 2
    return nb


def _const_spec(shape, *, single_buffer):
    """BlockSpec for grid-invariant operands (weight slabs, folded scale/bias).

    Constant index across the grid -> no need to double-buffer; single
    buffering halves the resident weight-slab VMEM (matters most under v7x's
    64 MiB VMEM).  Falls back to the default spec on older jax.
    """
    index_map = lambda g: (0,) * len(shape)
    if single_buffer and hasattr(pl, "Buffered"):
        return pl.BlockSpec(shape, index_map, pipeline_mode=pl.Buffered(1))
    return pl.BlockSpec(shape, index_map)


def _conv_bn_stats(x, w_slabs, scale_t, bias_t, *, nb, apply_input_bnrelu,
                   single_buffer_consts):
    """Fused conv layer: (N,H,W*Cin) -> ((N,H,W*Cout), (G,2,W*Cout) partials)."""
    N, H, WCin = x.shape
    WCout = w_slabs.shape[-1]
    G = N // nb
    Mp = nb * (H + 2)
    kernel = functools.partial(_conv_bn_stats_kernel, NB=nb, H=H,
                               apply_input_bnrelu=apply_input_bnrelu)

    flops = 2 * G * 3 * (Mp - 2) * WCin * WCout
    bytes_accessed = (4 * (N * H * WCin + N * H * WCout + G * 2 * WCout
                           + 2 * WCin)
                      + 2 * 3 * WCin * WCout)
    vmem_need = (4 * 2 * nb * H * (WCin + WCout)      # x / y double buffers
                 + 2 * 2 * 3 * WCin * WCout           # bf16 weight slabs
                 + 4 * (Mp * WCin + 4 * Mp * WCout)   # halo slab + matmul temps
                 + 4 * (2 * 2 * WCout + 4 * WCin))    # stats + scale/bias
    vmem_limit = int(min(max(2 * vmem_need, 32 << 20), 96 << 20))

    return pl.pallas_call(
        kernel,
        out_shape=(jax.ShapeDtypeStruct((N, H, WCout), jnp.float32),
                   jax.ShapeDtypeStruct((G, 2, WCout), jnp.float32)),
        grid=(G,),
        in_specs=[
            pl.BlockSpec((nb, H, WCin), lambda g: (g, 0, 0)),
            _const_spec((3, WCin, WCout), single_buffer=single_buffer_consts),
            _const_spec((1, WCin), single_buffer=single_buffer_consts),
            _const_spec((1, WCin), single_buffer=single_buffer_consts),
        ],
        out_specs=(
            pl.BlockSpec((nb, H, WCout), lambda g: (g, 0, 0)),
            pl.BlockSpec((1, 2, WCout), lambda g: (g, 0, 0)),
        ),
        scratch_shapes=[pltpu.VMEM((Mp, WCin), jnp.float32)],
        compiler_params=pltpu.CompilerParams(
            dimension_semantics=("parallel",),
            vmem_limit_bytes=vmem_limit),
        cost_estimate=pl.CostEstimate(flops=flops, transcendentals=0,
                                      bytes_accessed=bytes_accessed),
    )(x, w_slabs, scale_t, bias_t)


def _pick_row_tile(rows, target=512):
    """Largest row tile <= target that divides `rows` (and keeps 8-row align)."""
    if rows <= target:
        return rows
    for tr in range(target, 7, -1):
        if rows % tr == 0 and tr % 8 == 0:
            return tr
    return rows


def _bn_relu(y, scale_t, bias_t):
    """Final folded-BN + ReLU, in place over y, with large lane-dense tiles."""
    N, H, WC = y.shape
    rows = N * H
    tr = _pick_row_tile(rows)
    y2d = y.reshape(rows, WC)                  # free reshape: big row tiles
    out = pl.pallas_call(
        _bn_relu_kernel,
        out_shape=jax.ShapeDtypeStruct((rows, WC), jnp.float32),
        grid=(rows // tr,),
        in_specs=[
            pl.BlockSpec((tr, WC), lambda r: (r, 0)),
            pl.BlockSpec((1, WC), lambda r: (0, 0)),
            pl.BlockSpec((1, WC), lambda r: (0, 0)),
        ],
        out_specs=pl.BlockSpec((tr, WC), lambda r: (r, 0)),
        input_output_aliases={0: 0},
        compiler_params=pltpu.CompilerParams(
            dimension_semantics=("parallel",)),
    )(y2d, scale_t, bias_t)
    return out.reshape(N, H, WC)


def _fold_bn(stats, gamma, beta, count, eps=1e-5):
    """Training-mode BN folded to per-channel scale/bias from lane-dense
    (G, 2, W*C) [sum, sumsq] partials (W->C fold done here, in plain JAX)."""
    C = gamma.shape[0]
    s = jnp.sum(stats, axis=0).reshape(2, -1, C).sum(axis=1)   # (2, C)
    mean = s[0] / count
    var = jnp.maximum(s[1] / count - mean * mean, 0.0)         # biased variance
    scale = gamma * jax.lax.rsqrt(var + eps)
    bias = beta - mean * scale
    return scale, bias


def _tile_channels(v, W):
    """(C,) per-channel vector -> (1, W*C) row matching the (h, w*C+c) layout."""
    return jnp.tile(v, W).reshape(1, -1)


def conv2_forward_nhwc(x_nhwc, params, eps=1e-5, *, single_buffer_consts=True):
    """Conv2.forward in the transpose-free NHWC layout (training-mode BN)."""
    N, H, W, Cin = x_nhwc.shape
    Cout = params["w1"].shape[-1]
    count = N * H * W
    nb = _pick_nb(N, H)

    x = x_nhwc.reshape(N, H, W * Cin)                          # free reshape

    w1 = _prep_conv_weight(params["w1"], W)                    # (3, W*Cin,  W*Cout) bf16
    w2 = _prep_conv_weight(params["w2"], W)                    # (3, W*Cout, W*Cout) bf16

    # Layer 1: conv + BN partial stats (scale/bias inputs unused here).
    dummy = jnp.zeros((1, W * Cin), jnp.float32)
    y1, st1 = _conv_bn_stats(x, w1, dummy, dummy, nb=nb,
                             apply_input_bnrelu=False,
                             single_buffer_consts=single_buffer_consts)
    s1, b1 = _fold_bn(st1, params["gamma1"], params["beta1"], count, eps)

    # Layer 2: BN1+ReLU fused into the conv's input read, conv, BN partials.
    y2, st2 = _conv_bn_stats(y1, w2, _tile_channels(s1, W), _tile_channels(b1, W),
                             nb=nb, apply_input_bnrelu=True,
                             single_buffer_consts=single_buffer_consts)
    s2, b2 = _fold_bn(st2, params["gamma2"], params["beta2"], count, eps)

    # Final BN2 + ReLU, in place over y2 (large lane-dense tiles).
    out = _bn_relu(y2, _tile_channels(s2, W), _tile_channels(b2, W))
    return out.reshape(N, H, W, Cout)


def conv2_forward(x_nchw, params, eps=1e-5, *, single_buffer_consts=True):
    """Equivalent of Conv2.forward (training-mode BN). NCHW in / NCHW out.

    The NCHW<->NHWC boundary transposes are kept only for PyTorch API parity;
    NHWC callers should use conv2_forward_nhwc to skip these strided passes.
    """
    x = jnp.transpose(x_nchw, (0, 2, 3, 1))
    out = conv2_forward_nhwc(x, params, eps,
                             single_buffer_consts=single_buffer_consts)
    return jnp.transpose(out, (0, 3, 1, 2))


# ---------------------------------------------------------------------------
# Pure-JAX reference for validation
# ---------------------------------------------------------------------------
def _ref_conv(x_nhwc, w):
    return jax.lax.conv_general_dilated(
        x_nhwc, w, window_strides=(1, 1), padding="SAME",
        dimension_numbers=("NHWC", "HWIO", "NHWC"),
        precision=jax.lax.Precision.HIGHEST)


def reference_forward(x_nchw, params, eps=1e-5):
    x = jnp.transpose(x_nchw, (0, 2, 3, 1))
    y1 = _ref_conv(x, params["w1"])
    m1 = jnp.mean(y1, axis=(0, 1, 2)); v1 = jnp.var(y1, axis=(0, 1, 2))
    a1 = jnp.maximum((y1 - m1) * jax.lax.rsqrt(v1 + eps) * params["gamma1"]
                     + params["beta1"], 0.0)
    y2 = _ref_conv(a1, params["w2"])
    m2 = jnp.mean(y2, axis=(0, 1, 2)); v2 = jnp.var(y2, axis=(0, 1, 2))
    a2 = jnp.maximum((y2 - m2) * jax.lax.rsqrt(v2 + eps) * params["gamma2"]
                     + params["beta2"], 0.0)
    return jnp.transpose(a2, (0, 3, 1, 2))


# ---------------------------------------------------------------------------
if __name__ == "__main__":
    key = jax.random.PRNGKey(0)
    k1, k2, kx = jax.random.split(key, 3)

    N, Cin, H, W = 2, 4, 16, 16
    Cout = 8

    # Deterministic synthetic parameters (shapes per nn.Conv2d/nn.BatchNorm2d).
    params = {
        "w1": jax.random.normal(k1, (3, 3, Cin, Cout), jnp.float32) * 0.1,   # HWIO
        "gamma1": jnp.ones((Cout,), jnp.float32),
        "beta1": jnp.zeros((Cout,), jnp.float32),
        "w2": jax.random.normal(k2, (3, 3, Cout, Cout), jnp.float32) * 0.1,  # HWIO
        "gamma2": jnp.ones((Cout,), jnp.float32),
        "beta2": jnp.zeros((Cout,), jnp.float32),
    }
    x = jax.random.normal(kx, (N, Cin, H, W), jnp.float32)                   # NCHW

    ref = np.asarray(reference_forward(x, params))

    def _run(single_buffer_consts):
        fwd = jax.jit(functools.partial(
            conv2_forward, single_buffer_consts=single_buffer_consts))
        out = jax.block_until_ready(fwd(x, params))
        # Tolerances sized for bf16 MXU operands with f32 accumulation.
        np.testing.assert_allclose(np.asarray(out), ref, rtol=2e-2, atol=2e-2)
        return out

    try:
        _run(True)
    except Exception:
        # Fallback for jax builds without per-operand pipeline_mode support.
        _run(False)
    print("KERNEL_OK")
</pallas_src>

<mosaic_0001>
module attributes {stable_mosaic.version = 11 : i64} {
  func.func @_conv_bn_stats_kernel(%arg0: i32, %arg1: memref<2x16x64xf32, #tpu.memory_space<vmem>>, %arg2: memref<3x64x128xbf16, #tpu.memory_space<vmem>>, %arg3: memref<1x64xf32, #tpu.memory_space<vmem>>, %arg4: memref<1x64xf32, #tpu.memory_space<vmem>>, %arg5: memref<2x16x128xf32, #tpu.memory_space<vmem>>, %arg6: memref<1x2x128xf32, #tpu.memory_space<vmem>>, %arg7: memref<36x64xf32, #tpu.memory_space<vmem>>) attributes {dimension_semantics = [#tpu.dimension_semantics<parallel>], iteration_bounds = array<i64: 1>, scalar_prefetch = 0 : i64, scratch_operands = 1 : i64, tpu.core_type = #tpu.core_type<tc>, window_params = [{transform_indices = @transform_0, window_bounds = array<i64: 2, 16, 64>}, {pipeline_mode = #tpu.pipeline_mode<synchronous>, transform_indices = @transform_1, window_bounds = array<i64: 3, 64, 128>}, {pipeline_mode = #tpu.pipeline_mode<synchronous>, transform_indices = @transform_2, window_bounds = array<i64: 1, 64>}, {pipeline_mode = #tpu.pipeline_mode<synchronous>, transform_indices = @transform_3, window_bounds = array<i64: 1, 64>}, {transform_indices = @transform_4, window_bounds = array<i64: 2, 16, 128>}, {transform_indices = @transform_5, window_bounds = array<i64: 1, 2, 128>}]} {
    %c0 = arith.constant 0 : index
    %c0_0 = arith.constant 0 : index
    %c0_1 = arith.constant 0 : index
    %0 = vector.load %arg1[%c0, %c0_0, %c0_1] : memref<2x16x64xf32, #tpu.memory_space<vmem>>, vector<2x16x64xf32>
    %cst = arith.constant 0.000000e+00 : f32
    %1 = vector.broadcast %cst : f32 to vector<1x64xf32>
    %c0_2 = arith.constant 0 : index
    %c0_3 = arith.constant 0 : index
    %2 = vector.load %arg7[%c0_2, %c0_3] : memref<36x64xf32, #tpu.memory_space<vmem>>, vector<1x64xf32>
    tpu.vector_store %arg7[%c0_2, %c0_3], %1 {strides = array<i32>} : memref<36x64xf32, #tpu.memory_space<vmem>>, vector<1x64xf32>,
    %c17 = arith.constant 17 : index
    %c0_4 = arith.constant 0 : index
    %3 = vector.load %arg7[%c17, %c0_4] : memref<36x64xf32, #tpu.memory_space<vmem>>, vector<1x64xf32>
    tpu.vector_store %arg7[%c17, %c0_4], %1 {strides = array<i32>} : memref<36x64xf32, #tpu.memory_space<vmem>>, vector<1x64xf32>,
    %4 = vector.extract_strided_slice %0 {offsets = [0, 0, 0], sizes = [1, 16, 64], strides = [1, 1, 1]} : vector<2x16x64xf32> to vector<1x16x64xf32>
    %5 = vector.shape_cast %4 : vector<1x16x64xf32> to vector<16x64xf32>
    %c1 = arith.constant 1 : index
    %c0_5 = arith.constant 0 : index
    %6 = vector.load %arg7[%c1, %c0_5] : memref<36x64xf32, #tpu.memory_space<vmem>>, vector<16x64xf32>
    tpu.vector_store %arg7[%c1, %c0_5], %5 {strides = array<i32>} : memref<36x64xf32, #tpu.memory_space<vmem>>, vector<16x64xf32>,
    %c18 = arith.constant 18 : index
    %c0_6 = arith.constant 0 : index
    %7 = vector.load %arg7[%c18, %c0_6] : memref<36x64xf32, #tpu.memory_space<vmem>>, vector<1x64xf32>
    tpu.vector_store %arg7[%c18, %c0_6], %1 {strides = array<i32>} : memref<36x64xf32, #tpu.memory_space<vmem>>, vector<1x64xf32>,
    %c35 = arith.constant 35 : index
    %c0_7 = arith.constant 0 : index
    %8 = vector.load %arg7[%c35, %c0_7] : memref<36x64xf32, #tpu.memory_space<vmem>>, vector<1x64xf32>
    tpu.vector_store %arg7[%c35, %c0_7], %1 {strides = array<i32>} : memref<36x64xf32, #tpu.memory_space<vmem>>, vector<1x64xf32>,
    %9 = vector.extract_strided_slice %0 {offsets = [1, 0, 0], sizes = [1, 16, 64], strides = [1, 1, 1]} : vector<2x16x64xf32> to vector<1x16x64xf32>
    %10 = vector.shape_cast %9 : vector<1x16x64xf32> to vector<16x64xf32>
    %c19 = arith.constant 19 : index
    %c0_8 = arith.constant 0 : index
    %11 = vector.load %arg7[%c19, %c0_8] : memref<36x64xf32, #tpu.memory_space<vmem>>, vector<16x64xf32>
    tpu.vector_store %arg7[%c19, %c0_8], %10 {strides = array<i32>} : memref<36x64xf32, #tpu.memory_space<vmem>>, vector<16x64xf32>,
    %c0_9 = arith.constant 0 : index
    %c0_10 = arith.constant 0 : index
    %12 = vector.load %arg7[%c0_9, %c0_10] : memref<36x64xf32, #tpu.memory_space<vmem>>, vector<36x64xf32>
    %13 = arith.truncf %12 : vector<36x64xf32> to vector<36x64xbf16>
    %14 = vector.extract_strided_slice %13 {offsets = [0, 0], sizes = [34, 64], strides = [1, 1]} : vector<36x64xbf16> to vector<34x64xbf16>
    %c0_11 = arith.constant 0 : index
    %c0_12 = arith.constant 0 : index
    %c0_13 = arith.constant 0 : index
    %15 = vector.load %arg2[%c0_11, %c0_12, %c0_13] : memref<3x64x128xbf16, #tpu.memory_space<vmem>>, vector<1x64x128xbf16>
    %16 = vector.shape_cast %15 : vector<1x64x128xbf16> to vector<64x128xbf16>
    %cst_14 = arith.constant dense<0.000000e+00> : vector<34x128xf32>
    %17 = tpu.matmul %14, %16, %cst_14 {dimension_numbers = #tpu.dot_dimension_numbers<[1], [0], [0], [1], [0, 0, 1, 1], [], []>} : vector<34x64xbf16>, vector<64x128xbf16>, vector<34x128xf32> -> vector<34x128xf32>
    %18 = vector.extract_strided_slice %13 {offsets = [1, 0], sizes = [34, 64], strides = [1, 1]} : vector<36x64xbf16> to vector<34x64xbf16>
    %c1_15 = arith.constant 1 : index
    %c0_16 = arith.constant 0 : index
    %c0_17 = arith.constant 0 : index
    %19 = vector.load %arg2[%c1_15, %c0_16, %c0_17] : memref<3x64x128xbf16, #tpu.memory_space<vmem>>, vector<1x64x128xbf16>
    %20 = vector.shape_cast %19 : vector<1x64x128xbf16> to vector<64x128xbf16>
    %cst_18 = arith.constant dense<0.000000e+00> : vector<34x128xf32>
    %21 = tpu.matmul %18, %20, %cst_18 {dimension_numbers = #tpu.dot_dimension_numbers<[1], [0], [0], [1], [0, 0, 1, 1], [], []>} : vector<34x64xbf16>, vector<64x128xbf16>, vector<34x128xf32> -> vector<34x128xf32>
    %22 = arith.addf %17, %21 : vector<34x128xf32>
    %23 = vector.extract_strided_slice %13 {offsets = [2, 0], sizes = [34, 64], strides = [1, 1]} : vector<36x64xbf16> to vector<34x64xbf16>
    %c2 = arith.constant 2 : index
    %c0_19 = arith.constant 0 : index
    %c0_20 = arith.constant 0 : index
    %24 = vector.load %arg2[%c2, %c0_19, %c0_20] : memref<3x64x128xbf16, #tpu.memory_space<vmem>>, vector<1x64x128xbf16>
    %25 = vector.shape_cast %24 : vector<1x64x128xbf16> to vector<64x128xbf16>
    %cst_21 = arith.constant dense<0.000000e+00> : vector<34x128xf32>
    %26 = tpu.matmul %23, %25, %cst_21 {dimension_numbers = #tpu.dot_dimension_numbers<[1], [0], [0], [1], [0, 0, 1, 1], [], []>} : vector<34x64xbf16>, vector<64x128xbf16>, vector<34x128xf32> -> vector<34x128xf32>
    %27 = arith.addf %22, %26 : vector<34x128xf32>
    %cst_22 = arith.constant 0.000000e+00 : f32
    %28 = vector.broadcast %cst_22 : f32 to vector<1x128xf32>
    %cst_23 = arith.constant 0.000000e+00 : f32
    %29 = vector.broadcast %cst_23 : f32 to vector<1x128xf32>
    %30 = vector.extract_strided_slice %27 {offsets = [0, 0], sizes = [16, 128], strides = [1, 1]} : vector<34x128xf32> to vector<16x128xf32>
    %c0_24 = arith.constant 0 : index
    %c0_25 = arith.constant 0 : index
    %c0_26 = arith.constant 0 : index
    %31 = vector.load %arg5[%c0_24, %c0_25, %c0_26] : memref<2x16x128xf32, #tpu.memory_space<vmem>>, vector<1x16x128xf32>
    %32 = vector.shape_cast %31 : vector<1x16x128xf32> to vector<16x128xf32>
    %33 = vector.shape_cast %30 : vector<16x128xf32> to vector<1x16x128xf32>
    tpu.vector_store %arg5[%c0_24, %c0_25, %c0_26], %33 {strides = array<i32>} : memref<2x16x128xf32, #tpu.memory_space<vmem>>, vector<1x16x128xf32>,
    %cst_27 = arith.constant dense<0.000000e+00> : vector<128xf32>
    %34 = vector.multi_reduction <add>, %30, %cst_27 [0] : vector<16x128xf32> to vector<128xf32>
    %35 = vector.shape_cast %34 : vector<128xf32> to vector<1x128xf32>
    %36 = arith.addf %28, %35 : vector<1x128xf32>
    %37 = arith.mulf %30, %30 : vector<16x128xf32>
    %cst_28 = arith.constant dense<0.000000e+00> : vector<128xf32>
    %38 = vector.multi_reduction <add>, %37, %cst_28 [0] : vector<16x128xf32> to vector<128xf32>
    %39 = vector.shape_cast %38 : vector<128xf32> to vector<1x128xf32>
    %40 = arith.addf %29, %39 : vector<1x128xf32>
    %41 = vector.extract_strided_slice %27 {offsets = [18, 0], sizes = [16, 128], strides = [1, 1]} : vector<34x128xf32> to vector<16x128xf32>
    %c1_29 = arith.constant 1 : index
    %c0_30 = arith.constant 0 : index
    %c0_31 = arith.constant 0 : index
    %42 = vector.load %arg5[%c1_29, %c0_30, %c0_31] : memref<2x16x128xf32, #tpu.memory_space<vmem>>, vector<1x16x128xf32>
    %43 = vector.shape_cast %42 : vector<1x16x128xf32> to vector<16x128xf32>
    %44 = vector.shape_cast %41 : vector<16x128xf32> to vector<1x16x128xf32>
    tpu.vector_store %arg5[%c1_29, %c0_30, %c0_31], %44 {strides = array<i32>} : memref<2x16x128xf32, #tpu.memory_space<vmem>>, vector<1x16x128xf32>,
    %cst_32 = arith.constant dense<0.000000e+00> : vector<128xf32>
    %45 = vector.multi_reduction <add>, %41, %cst_32 [0] : vector<16x128xf32> to vector<128xf32>
    %46 = vector.shape_cast %45 : vector<128xf32> to vector<1x128xf32>
    %47 = arith.addf %36, %46 : vector<1x128xf32>
    %48 = arith.mulf %41, %41 : vector<16x128xf32>
    %cst_33 = arith.constant dense<0.000000e+00> : vector<128xf32>
    %49 = vector.multi_reduction <add>, %48, %cst_33 [0] : vector<16x128xf32> to vector<128xf32>
    %50 = vector.shape_cast %49 : vector<128xf32> to vector<1x128xf32>
    %51 = arith.addf %40, %50 : vector<1x128xf32>
    %c0_34 = arith.constant 0 : index
    %c0_35 = arith.constant 0 : index
    %c0_36 = arith.constant 0 : index
    %52 = vector.load %arg6[%c0_34, %c0_35, %c0_36] : memref<1x2x128xf32, #tpu.memory_space<vmem>>, vector<1x1x128xf32>
    %53 = vector.shape_cast %52 : vector<1x1x128xf32> to vector<1x128xf32>
    %54 = vector.shape_cast %47 : vector<1x128xf32> to vector<1x1x128xf32>
    tpu.vector_store %arg6[%c0_34, %c0_35, %c0_36], %54 {strides = array<i32>} : memref<1x2x128xf32, #tpu.memory_space<vmem>>, vector<1x1x128xf32>,
    %c0_37 = arith.constant 0 : index
    %c1_38 = arith.constant 1 : index
    %c0_39 = arith.constant 0 : index
    %55 = vector.load %arg6[%c0_37, %c1_38, %c0_39] : memref<1x2x128xf32, #tpu.memory_space<vmem>>, vector<1x1x128xf32>
    %56 = vector.shape_cast %55 : vector<1x1x128xf32> to vector<1x128xf32>
    %57 = vector.shape_cast %51 : vector<1x128xf32> to vector<1x1x128xf32>
    tpu.vector_store %arg6[%c0_37, %c1_38, %c0_39], %57 {strides = array<i32>} : memref<1x2x128xf32, #tpu.memory_space<vmem>>, vector<1x1x128xf32>,
    return
  }
  func.func @transform_0(%arg0: i32) -> (i32, i32, i32) {
    %c0_i32 = arith.constant 0 : i32
    %c0_i32_0 = arith.constant 0 : i32
    %c0_i32_1 = arith.constant 0 : i32
    return %arg0, %c0_i32, %c0_i32_0 : i32, i32, i32
  }
  func.func @transform_1(%arg0: i32) -> (i32, i32, i32) {
    %c0_i32 = arith.constant 0 : i32
    %c0_i32_0 = arith.constant 0 : i32
    %c0_i32_1 = arith.constant 0 : i32
    %c0_i32_2 = arith.constant 0 : i32
    return %c0_i32, %c0_i32_0, %c0_i32_1 : i32, i32, i32
  }
  func.func @transform_2(%arg0: i32) -> (i32, i32) {
    %c0_i32 = arith.constant 0 : i32
    %c0_i32_0 = arith.constant 0 : i32
    %c0_i32_1 = arith.constant 0 : i32
    return %c0_i32, %c0_i32_0 : i32, i32
  }
  func.func @transform_3(%arg0: i32) -> (i32, i32) {
    %c0_i32 = arith.constant 0 : i32
    %c0_i32_0 = arith.constant 0 : i32
    %c0_i32_1 = arith.constant 0 : i32
    return %c0_i32, %c0_i32_0 : i32, i32
  }
  func.func @transform_4(%arg0: i32) -> (i32, i32, i32) {
    %c0_i32 = arith.constant 0 : i32
    %c0_i32_0 = arith.constant 0 : i32
    %c0_i32_1 = arith.constant 0 : i32
    return %arg0, %c0_i32, %c0_i32_0 : i32, i32, i32
  }
  func.func @transform_5(%arg0: i32) -> (i32, i32, i32) {
    %c0_i32 = arith.constant 0 : i32
    %c0_i32_0 = arith.constant 0 : i32
    %c0_i32_1 = arith.constant 0 : i32
    return %arg0, %c0_i32, %c0_i32_0 : i32, i32, i32
  }
}

module attributes {stable_mosaic.version = 11 : i64} {
  func.func @_conv_bn_stats_kernel(%arg0: i32, %arg1: memref<2x16x128xf32, #tpu.memory_space<vmem>>, %arg2: memref<3x128x128xbf16, #tpu.memory_space<vmem>>, %arg3: memref<1x128xf32, #tpu.memory_space<vmem>>, %arg4: memref<1x128xf32, #tpu.memory_space<vmem>>, %arg5: memref<2x16x128xf32, #tpu.memory_space<vmem>>, %arg6: memref<1x2x128xf32, #tpu.memory_space<vmem>>, %arg7: memref<36x128xf32, #tpu.memory_space<vmem>>) attributes {dimension_semantics = [#tpu.dimension_semantics<parallel>], iteration_bounds = array<i64: 1>, scalar_prefetch = 0 : i64, scratch_operands = 1 : i64, tpu.core_type = #tpu.core_type<tc>, window_params = [{transform_indices = @transform_0, window_bounds = array<i64: 2, 16, 128>}, {pipeline_mode = #tpu.pipeline_mode<synchronous>, transform_indices = @transform_1, window_bounds = array<i64: 3, 128, 128>}, {pipeline_mode = #tpu.pipeline_mode<synchronous>, transform_indices = @transform_2, window_bounds = array<i64: 1, 128>}, {pipeline_mode = #tpu.pipeline_mode<synchronous>, transform_indices = @transform_3, window_bounds = array<i64: 1, 128>}, {transform_indices = @transform_4, window_bounds = array<i64: 2, 16, 128>}, {transform_indices = @transform_5, window_bounds = array<i64: 1, 2, 128>}]} {
    %c0 = arith.constant 0 : index
    %c0_0 = arith.constant 0 : index
    %c0_1 = arith.constant 0 : index
    %0 = vector.load %arg1[%c0, %c0_0, %c0_1] : memref<2x16x128xf32, #tpu.memory_space<vmem>>, vector<2x16x128xf32>
    %c0_2 = arith.constant 0 : index
    %c0_3 = arith.constant 0 : index
    %1 = vector.load %arg3[%c0_2, %c0_3] : memref<1x128xf32, #tpu.memory_space<vmem>>, vector<1x128xf32>
    %2 = vector.shape_cast %1 : vector<1x128xf32> to vector<1x1x128xf32>
    %3 = vector.broadcast %2 : vector<1x1x128xf32> to vector<2x16x128xf32>
    %4 = arith.mulf %0, %3 : vector<2x16x128xf32>
    %c0_4 = arith.constant 0 : index
    %c0_5 = arith.constant 0 : index
    %5 = vector.load %arg4[%c0_4, %c0_5] : memref<1x128xf32, #tpu.memory_space<vmem>>, vector<1x128xf32>
    %6 = vector.shape_cast %5 : vector<1x128xf32> to vector<1x1x128xf32>
    %7 = vector.broadcast %6 : vector<1x1x128xf32> to vector<2x16x128xf32>
    %8 = arith.addf %4, %7 : vector<2x16x128xf32>
    %cst = arith.constant 0.000000e+00 : f32
    %9 = vector.broadcast %cst : f32 to vector<2x16x128xf32>
    %10 = arith.maximumf %8, %9 : vector<2x16x128xf32>
    %cst_6 = arith.constant 0.000000e+00 : f32
    %11 = vector.broadcast %cst_6 : f32 to vector<1x128xf32>
    %c0_7 = arith.constant 0 : index
    %c0_8 = arith.constant 0 : index
    %12 = vector.load %arg7[%c0_7, %c0_8] : memref<36x128xf32, #tpu.memory_space<vmem>>, vector<1x128xf32>
    tpu.vector_store %arg7[%c0_7, %c0_8], %11 {strides = array<i32>} : memref<36x128xf32, #tpu.memory_space<vmem>>, vector<1x128xf32>,
    %c17 = arith.constant 17 : index
    %c0_9 = arith.constant 0 : index
    %13 = vector.load %arg7[%c17, %c0_9] : memref<36x128xf32, #tpu.memory_space<vmem>>, vector<1x128xf32>
    tpu.vector_store %arg7[%c17, %c0_9], %11 {strides = array<i32>} : memref<36x128xf32, #tpu.memory_space<vmem>>, vector<1x128xf32>,
    %14 = vector.extract_strided_slice %10 {offsets = [0, 0, 0], sizes = [1, 16, 128], strides = [1, 1, 1]} : vector<2x16x128xf32> to vector<1x16x128xf32>
    %15 = vector.shape_cast %14 : vector<1x16x128xf32> to vector<16x128xf32>
    %c1 = arith.constant 1 : index
    %c0_10 = arith.constant 0 : index
    %16 = vector.load %arg7[%c1, %c0_10] : memref<36x128xf32, #tpu.memory_space<vmem>>, vector<16x128xf32>
    tpu.vector_store %arg7[%c1, %c0_10], %15 {strides = array<i32>} : memref<36x128xf32, #tpu.memory_space<vmem>>, vector<16x128xf32>,
    %c18 = arith.constant 18 : index
    %c0_11 = arith.constant 0 : index
    %17 = vector.load %arg7[%c18, %c0_11] : memref<36x128xf32, #tpu.memory_space<vmem>>, vector<1x128xf32>
    tpu.vector_store %arg7[%c18, %c0_11], %11 {strides = array<i32>} : memref<36x128xf32, #tpu.memory_space<vmem>>, vector<1x128xf32>,
    %c35 = arith.constant 35 : index
    %c0_12 = arith.constant 0 : index
    %18 = vector.load %arg7[%c35, %c0_12] : memref<36x128xf32, #tpu.memory_space<vmem>>, vector<1x128xf32>
    tpu.vector_store %arg7[%c35, %c0_12], %11 {strides = array<i32>} : memref<36x128xf32, #tpu.memory_space<vmem>>, vector<1x128xf32>,
    %19 = vector.extract_strided_slice %10 {offsets = [1, 0, 0], sizes = [1, 16, 128], strides = [1, 1, 1]} : vector<2x16x128xf32> to vector<1x16x128xf32>
    %20 = vector.shape_cast %19 : vector<1x16x128xf32> to vector<16x128xf32>
    %c19 = arith.constant 19 : index
    %c0_13 = arith.constant 0 : index
    %21 = vector.load %arg7[%c19, %c0_13] : memref<36x128xf32, #tpu.memory_space<vmem>>, vector<16x128xf32>
    tpu.vector_store %arg7[%c19, %c0_13], %20 {strides = array<i32>} : memref<36x128xf32, #tpu.memory_space<vmem>>, vector<16x128xf32>,
    %c0_14 = arith.constant 0 : index
    %c0_15 = arith.constant 0 : index
    %22 = vector.load %arg7[%c0_14, %c0_15] : memref<36x128xf32, #tpu.memory_space<vmem>>, vector<36x128xf32>
    %23 = arith.truncf %22 : vector<36x128xf32> to vector<36x128xbf16>
    %24 = vector.extract_strided_slice %23 {offsets = [0, 0], sizes = [34, 128], strides = [1, 1]} : vector<36x128xbf16> to vector<34x128xbf16>
    %c0_16 = arith.constant 0 : index
    %c0_17 = arith.constant 0 : index
    %c0_18 = arith.constant 0 : index
    %25 = vector.load %arg2[%c0_16, %c0_17, %c0_18] : memref<3x128x128xbf16, #tpu.memory_space<vmem>>, vector<1x128x128xbf16>
    %26 = vector.shape_cast %25 : vector<1x128x128xbf16> to vector<128x128xbf16>
    %cst_19 = arith.constant dense<0.000000e+00> : vector<34x128xf32>
    %27 = tpu.matmul %24, %26, %cst_19 {dimension_numbers = #tpu.dot_dimension_numbers<[1], [0], [0], [1], [0, 0, 1, 1], [], []>} : vector<34x128xbf16>, vector<128x128xbf16>, vector<34x128xf32> -> vector<34x128xf32>
    %28 = vector.extract_strided_slice %23 {offsets = [1, 0], sizes = [34, 128], strides = [1, 1]} : vector<36x128xbf16> to vector<34x128xbf16>
    %c1_20 = arith.constant 1 : index
    %c0_21 = arith.constant 0 : index
    %c0_22 = arith.constant 0 : index
    %29 = vector.load %arg2[%c1_20, %c0_21, %c0_22] : memref<3x128x128xbf16, #tpu.memory_space<vmem>>, vector<1x128x128xbf16>
    %30 = vector.shape_cast %29 : vector<1x128x128xbf16> to vector<128x128xbf16>
    %cst_23 = arith.constant dense<0.000000e+00> : vector<34x128xf32>
    %31 = tpu.matmul %28, %30, %cst_23 {dimension_numbers = #tpu.dot_dimension_numbers<[1], [0], [0], [1], [0, 0, 1, 1], [], []>} : vector<34x128xbf16>, vector<128x128xbf16>, vector<34x128xf32> -> vector<34x128xf32>
    %32 = arith.addf %27, %31 : vector<34x128xf32>
    %33 = vector.extract_strided_slice %23 {offsets = [2, 0], sizes = [34, 128], strides = [1, 1]} : vector<36x128xbf16> to vector<34x128xbf16>
    %c2 = arith.constant 2 : index
    %c0_24 = arith.constant 0 : index
    %c0_25 = arith.constant 0 : index
    %34 = vector.load %arg2[%c2, %c0_24, %c0_25] : memref<3x128x128xbf16, #tpu.memory_space<vmem>>, vector<1x128x128xbf16>
    %35 = vector.shape_cast %34 : vector<1x128x128xbf16> to vector<128x128xbf16>
    %cst_26 = arith.constant dense<0.000000e+00> : vector<34x128xf32>
    %36 = tpu.matmul %33, %35, %cst_26 {dimension_numbers = #tpu.dot_dimension_numbers<[1], [0], [0], [1], [0, 0, 1, 1], [], []>} : vector<34x128xbf16>, vector<128x128xbf16>, vector<34x128xf32> -> vector<34x128xf32>
    %37 = arith.addf %32, %36 : vector<34x128xf32>
    %cst_27 = arith.constant 0.000000e+00 : f32
    %38 = vector.broadcast %cst_27 : f32 to vector<1x128xf32>
    %cst_28 = arith.constant 0.000000e+00 : f32
    %39 = vector.broadcast %cst_28 : f32 to vector<1x128xf32>
    %40 = vector.extract_strided_slice %37 {offsets = [0, 0], sizes = [16, 128], strides = [1, 1]} : vector<34x128xf32> to vector<16x128xf32>
    %c0_29 = arith.constant 0 : index
    %c0_30 = arith.constant 0 : index
    %c0_31 = arith.constant 0 : index
    %41 = vector.load %arg5[%c0_29, %c0_30, %c0_31] : memref<2x16x128xf32, #tpu.memory_space<vmem>>, vector<1x16x128xf32>
    %42 = vector.shape_cast %41 : vector<1x16x128xf32> to vector<16x128xf32>
    %43 = vector.shape_cast %40 : vector<16x128xf32> to vector<1x16x128xf32>
    tpu.vector_store %arg5[%c0_29, %c0_30, %c0_31], %43 {strides = array<i32>} : memref<2x16x128xf32, #tpu.memory_space<vmem>>, vector<1x16x128xf32>,
    %cst_32 = arith.constant dense<0.000000e+00> : vector<128xf32>
    %44 = vector.multi_reduction <add>, %40, %cst_32 [0] : vector<16x128xf32> to vector<128xf32>
    %45 = vector.shape_cast %44 : vector<128xf32> to vector<1x128xf32>
    %46 = arith.addf %38, %45 : vector<1x128xf32>
    %47 = arith.mulf %40, %40 : vector<16x128xf32>
    %cst_33 = arith.constant dense<0.000000e+00> : vector<128xf32>
    %48 = vector.multi_reduction <add>, %47, %cst_33 [0] : vector<16x128xf32> to vector<128xf32>
    %49 = vector.shape_cast %48 : vector<128xf32> to vector<1x128xf32>
    %50 = arith.addf %39, %49 : vector<1x128xf32>
    %51 = vector.extract_strided_slice %37 {offsets = [18, 0], sizes = [16, 128], strides = [1, 1]} : vector<34x128xf32> to vector<16x128xf32>
    %c1_34 = arith.constant 1 : index
    %c0_35 = arith.constant 0 : index
    %c0_36 = arith.constant 0 : index
    %52 = vector.load %arg5[%c1_34, %c0_35, %c0_36] : memref<2x16x128xf32, #tpu.memory_space<vmem>>, vector<1x16x128xf32>
    %53 = vector.shape_cast %52 : vector<1x16x128xf32> to vector<16x128xf32>
    %54 = vector.shape_cast %51 : vector<16x128xf32> to vector<1x16x128xf32>
    tpu.vector_store %arg5[%c1_34, %c0_35, %c0_36], %54 {strides = array<i32>} : memref<2x16x128xf32, #tpu.memory_space<vmem>>, vector<1x16x128xf32>,
    %cst_37 = arith.constant dense<0.000000e+00> : vector<128xf32>
    %55 = vector.multi_reduction <add>, %51, %cst_37 [0] : vector<16x128xf32> to vector<128xf32>
    %56 = vector.shape_cast %55 : vector<128xf32> to vector<1x128xf32>
    %57 = arith.addf %46, %56 : vector<1x128xf32>
    %58 = arith.mulf %51, %51 : vector<16x128xf32>
    %cst_38 = arith.constant dense<0.000000e+00> : vector<128xf32>
    %59 = vector.multi_reduction <add>, %58, %cst_38 [0] : vector<16x128xf32> to vector<128xf32>
    %60 = vector.shape_cast %59 : vector<128xf32> to vector<1x128xf32>
    %61 = arith.addf %50, %60 : vector<1x128xf32>
    %c0_39 = arith.constant 0 : index
    %c0_40 = arith.constant 0 : index
    %c0_41 = arith.constant 0 : index
    %62 = vector.load %arg6[%c0_39, %c0_40, %c0_41] : memref<1x2x128xf32, #tpu.memory_space<vmem>>, vector<1x1x128xf32>
    %63 = vector.shape_cast %62 : vector<1x1x128xf32> to vector<1x128xf32>
    %64 = vector.shape_cast %57 : vector<1x128xf32> to vector<1x1x128xf32>
    tpu.vector_store %arg6[%c0_39, %c0_40, %c0_41], %64 {strides = array<i32>} : memref<1x2x128xf32, #tpu.memory_space<vmem>>, vector<1x1x128xf32>,
    %c0_42 = arith.constant 0 : index
    %c1_43 = arith.constant 1 : index
    %c0_44 = arith.constant 0 : index
    %65 = vector.load %arg6[%c0_42, %c1_43, %c0_44] : memref<1x2x128xf32, #tpu.memory_space<vmem>>, vector<1x1x128xf32>
    %66 = vector.shape_cast %65 : vector<1x1x128xf32> to vector<1x128xf32>
    %67 = vector.shape_cast %61 : vector<1x128xf32> to vector<1x1x128xf32>
    tpu.vector_store %arg6[%c0_42, %c1_43, %c0_44], %67 {strides = array<i32>} : memref<1x2x128xf32, #tpu.memory_space<vmem>>, vector<1x1x128xf32>,
    return
  }
  func.func @transform_0(%arg0: i32) -> (i32, i32, i32) {
    %c0_i32 = arith.constant 0 : i32
    %c0_i32_0 = arith.constant 0 : i32
    %c0_i32_1 = arith.constant 0 : i32
    return %arg0, %c0_i32, %c0_i32_0 : i32, i32, i32
  }
  func.func @transform_1(%arg0: i32) -> (i32, i32, i32) {
    %c0_i32 = arith.constant 0 : i32
    %c0_i32_0 = arith.constant 0 : i32
    %c0_i32_1 = arith.constant 0 : i32
    %c0_i32_2 = arith.constant 0 : i32
    return %c0_i32, %c0_i32_0, %c0_i32_1 : i32, i32, i32
  }
  func.func @transform_2(%arg0: i32) -> (i32, i32) {
    %c0_i32 = arith.constant 0 : i32
    %c0_i32_0 = arith.constant 0 : i32
    %c0_i32_1 = arith.constant 0 : i32
    return %c0_i32, %c0_i32_0 : i32, i32
  }
  func.func @transform_3(%arg0: i32) -> (i32, i32) {
    %c0_i32 = arith.constant 0 : i32
    %c0_i32_0 = arith.constant 0 : i32
    %c0_i32_1 = arith.constant 0 : i32
    return %c0_i32, %c0_i32_0 : i32, i32
  }
  func.func @transform_4(%arg0: i32) -> (i32, i32, i32) {
    %c0_i32 = arith.constant 0 : i32
    %c0_i32_0 = arith.constant 0 : i32
    %c0_i32_1 = arith.constant 0 : i32
    return %arg0, %c0_i32, %c0_i32_0 : i32, i32, i32
  }
  func.func @transform_5(%arg0: i32) -> (i32, i32, i32) {
    %c0_i32 = arith.constant 0 : i32
    %c0_i32_0 = arith.constant 0 : i32
    %c0_i32_1 = arith.constant 0 : i32
    return %arg0, %c0_i32, %c0_i32_0 : i32, i32, i32
  }
}

module attributes {stable_mosaic.version = 11 : i64} {
  func.func @_bn_relu_kernel(%arg0: i32, %arg1: memref<32x128xf32, #tpu.memory_space<vmem>>, %arg2: memref<1x128xf32, #tpu.memory_space<vmem>>, %arg3: memref<1x128xf32, #tpu.memory_space<vmem>>, %arg4: memref<32x128xf32, #tpu.memory_space<vmem>>) attributes {dimension_semantics = [#tpu.dimension_semantics<parallel>], iteration_bounds = array<i64: 1>, scalar_prefetch = 0 : i64, scratch_operands = 0 : i64, tpu.core_type = #tpu.core_type<tc>, window_params = [{transform_indices = @transform_0, window_bounds = array<i64: 32, 128>}, {pipeline_mode = #tpu.pipeline_mode<synchronous>, transform_indices = @transform_1, window_bounds = array<i64: 1, 128>}, {pipeline_mode = #tpu.pipeline_mode<synchronous>, transform_indices = @transform_2, window_bounds = array<i64: 1, 128>}, {transform_indices = @transform_3, window_bounds = array<i64: 32, 128>}]} {
    %c0 = arith.constant 0 : index
    %c0_0 = arith.constant 0 : index
    %0 = vector.load %arg1[%c0, %c0_0] : memref<32x128xf32, #tpu.memory_space<vmem>>, vector<32x128xf32>
    %c0_1 = arith.constant 0 : index
    %c0_2 = arith.constant 0 : index
    %1 = vector.load %arg2[%c0_1, %c0_2] : memref<1x128xf32, #tpu.memory_space<vmem>>, vector<1x128xf32>
    %2 = vector.broadcast %1 : vector<1x128xf32> to vector<32x128xf32>
    %3 = arith.mulf %0, %2 : vector<32x128xf32>
    %c0_3 = arith.constant 0 : index
    %c0_4 = arith.constant 0 : index
    %4 = vector.load %arg3[%c0_3, %c0_4] : memref<1x128xf32, #tpu.memory_space<vmem>>, vector<1x128xf32>
    %5 = vector.broadcast %4 : vector<1x128xf32> to vector<32x128xf32>
    %6 = arith.addf %3, %5 : vector<32x128xf32>
    %cst = arith.constant 0.000000e+00 : f32
    %7 = vector.broadcast %cst : f32 to vector<32x128xf32>
    %8 = arith.maximumf %6, %7 : vector<32x128xf32>
    %c0_5 = arith.constant 0 : index
    %c0_6 = arith.constant 0 : index
    %9 = vector.load %arg4[%c0_5, %c0_6] : memref<32x128xf32, #tpu.memory_space<vmem>>, vector<32x128xf32>
    tpu.vector_store %arg4[%c0_5, %c0_6], %8 {strides = array<i32>} : memref<32x128xf32, #tpu.memory_space<vmem>>, vector<32x128xf32>,
    return
  }
  func.func @transform_0(%arg0: i32) -> (i32, i32) {
    %c0_i32 = arith.constant 0 : i32
    %c0_i32_0 = arith.constant 0 : i32
    return %arg0, %c0_i32 : i32, i32
  }
  func.func @transform_1(%arg0: i32) -> (i32, i32) {
    %c0_i32 = arith.constant 0 : i32
    %c0_i32_0 = arith.constant 0 : i32
    %c0_i32_1 = arith.constant 0 : i32
    return %c0_i32, %c0_i32_0 : i32, i32
  }
  func.func @transform_2(%arg0: i32) -> (i32, i32) {
    %c0_i32 = arith.constant 0 : i32
    %c0_i32_0 = arith.constant 0 : i32
    %c0_i32_1 = arith.constant 0 : i32
    return %c0_i32, %c0_i32_0 : i32, i32
  }
  func.func @transform_3(%arg0: i32) -> (i32, i32) {
    %c0_i32 = arith.constant 0 : i32
    %c0_i32_0 = arith.constant 0 : i32
    return %arg0, %c0_i32 : i32, i32
  }
}

module attributes {stable_mosaic.version = 11 : i64} {
  func.func @_conv_bn_stats_kernel(%arg0: i32, %arg1: memref<2x16x64xf32, #tpu.memory_space<vmem>>, %arg2: memref<3x64x128xbf16, #tpu.memory_space<vmem>>, %arg3: memref<1x64xf32, #tpu.memory_space<vmem>>, %arg4: memref<1x64xf32, #tpu.memory_space<vmem>>, %arg5: memref<2x16x128xf32, #tpu.memory_space<vmem>>, %arg6: memref<1x2x128xf32, #tpu.memory_space<vmem>>, %arg7: memref<36x64xf32, #tpu.memory_space<vmem>>) attributes {dimension_semantics = [#tpu.dimension_semantics<parallel>], iteration_bounds = array<i64: 1>, scalar_prefetch = 0 : i64, scratch_operands = 1 : i64, tpu.core_type = #tpu.core_type<tc>, window_params = [{transform_indices = @transform_0, window_bounds = array<i64: 2, 16, 64>}, {pipeline_mode = #tpu.pipeline_mode<synchronous>, transform_indices = @transform_1, window_bounds = array<i64: 3, 64, 128>}, {pipeline_mode = #tpu.pipeline_mode<synchronous>, transform_indices = @transform_2, window_bounds = array<i64: 1, 64>}, {pipeline_mode = #tpu.pipeline_mode<synchronous>, transform_indices = @transform_3, window_bounds = array<i64: 1, 64>}, {transform_indices = @transform_4, window_bounds = array<i64: 2, 16, 128>}, {transform_indices = @transform_5, window_bounds = array<i64: 1, 2, 128>}]} {
    %c0 = arith.constant 0 : index
    %c0_0 = arith.constant 0 : index
    %c0_1 = arith.constant 0 : index
    %0 = vector.load %arg1[%c0, %c0_0, %c0_1] : memref<2x16x64xf32, #tpu.memory_space<vmem>>, vector<2x16x64xf32>
    %cst = arith.constant 0.000000e+00 : f32
    %1 = vector.broadcast %cst : f32 to vector<1x64xf32>
    %c0_2 = arith.constant 0 : index
    %c0_3 = arith.constant 0 : index
    %2 = vector.load %arg7[%c0_2, %c0_3] : memref<36x64xf32, #tpu.memory_space<vmem>>, vector<1x64xf32>
    tpu.vector_store %arg7[%c0_2, %c0_3], %1 {strides = array<i32>} : memref<36x64xf32, #tpu.memory_space<vmem>>, vector<1x64xf32>,
    %c17 = arith.constant 17 : index
    %c0_4 = arith.constant 0 : index
    %3 = vector.load %arg7[%c17, %c0_4] : memref<36x64xf32, #tpu.memory_space<vmem>>, vector<1x64xf32>
    tpu.vector_store %arg7[%c17, %c0_4], %1 {strides = array<i32>} : memref<36x64xf32, #tpu.memory_space<vmem>>, vector<1x64xf32>,
    %4 = vector.extract_strided_slice %0 {offsets = [0, 0, 0], sizes = [1, 16, 64], strides = [1, 1, 1]} : vector<2x16x64xf32> to vector<1x16x64xf32>
    %5 = vector.shape_cast %4 : vector<1x16x64xf32> to vector<16x64xf32>
    %c1 = arith.constant 1 : index
    %c0_5 = arith.constant 0 : index
    %6 = vector.load %arg7[%c1, %c0_5] : memref<36x64xf32, #tpu.memory_space<vmem>>, vector<16x64xf32>
    tpu.vector_store %arg7[%c1, %c0_5], %5 {strides = array<i32>} : memref<36x64xf32, #tpu.memory_space<vmem>>, vector<16x64xf32>,
    %c18 = arith.constant 18 : index
    %c0_6 = arith.constant 0 : index
    %7 = vector.load %arg7[%c18, %c0_6] : memref<36x64xf32, #tpu.memory_space<vmem>>, vector<1x64xf32>
    tpu.vector_store %arg7[%c18, %c0_6], %1 {strides = array<i32>} : memref<36x64xf32, #tpu.memory_space<vmem>>, vector<1x64xf32>,
    %c35 = arith.constant 35 : index
    %c0_7 = arith.constant 0 : index
    %8 = vector.load %arg7[%c35, %c0_7] : memref<36x64xf32, #tpu.memory_space<vmem>>, vector<1x64xf32>
    tpu.vector_store %arg7[%c35, %c0_7], %1 {strides = array<i32>} : memref<36x64xf32, #tpu.memory_space<vmem>>, vector<1x64xf32>,
    %9 = vector.extract_strided_slice %0 {offsets = [1, 0, 0], sizes = [1, 16, 64], strides = [1, 1, 1]} : vector<2x16x64xf32> to vector<1x16x64xf32>
    %10 = vector.shape_cast %9 : vector<1x16x64xf32> to vector<16x64xf32>
    %c19 = arith.constant 19 : index
    %c0_8 = arith.constant 0 : index
    %11 = vector.load %arg7[%c19, %c0_8] : memref<36x64xf32, #tpu.memory_space<vmem>>, vector<16x64xf32>
    tpu.vector_store %arg7[%c19, %c0_8], %10 {strides = array<i32>} : memref<36x64xf32, #tpu.memory_space<vmem>>, vector<16x64xf32>,
    %c0_9 = arith.constant 0 : index
    %c0_10 = arith.constant 0 : index
    %12 = vector.load %arg7[%c0_9, %c0_10] : memref<36x64xf32, #tpu.memory_space<vmem>>, vector<36x64xf32>
    %13 = arith.truncf %12 : vector<36x64xf32> to vector<36x64xbf16>
    %14 = vector.extract_strided_slice %13 {offsets = [0, 0], sizes = [34, 64], strides = [1, 1]} : vector<36x64xbf16> to vector<34x64xbf16>
    %c0_11 = arith.constant 0 : index
    %c0_12 = arith.constant 0 : index
    %c0_13 = arith.constant 0 : index
    %15 = vector.load %arg2[%c0_11, %c0_12, %c0_13] : memref<3x64x128xbf16, #tpu.memory_space<vmem>>, vector<1x64x128xbf16>
    %16 = vector.shape_cast %15 : vector<1x64x128xbf16> to vector<64x128xbf16>
    %cst_14 = arith.constant dense<0.000000e+00> : vector<34x128xf32>
    %17 = tpu.matmul %14, %16, %cst_14 {dimension_numbers = #tpu.dot_dimension_numbers<[1], [0], [0], [1], [0, 0, 1, 1], [], []>} : vector<34x64xbf16>, vector<64x128xbf16>, vector<34x128xf32> -> vector<34x128xf32>
    %18 = vector.extract_strided_slice %13 {offsets = [1, 0], sizes = [34, 64], strides = [1, 1]} : vector<36x64xbf16> to vector<34x64xbf16>
    %c1_15 = arith.constant 1 : index
    %c0_16 = arith.constant 0 : index
    %c0_17 = arith.constant 0 : index
    %19 = vector.load %arg2[%c1_15, %c0_16, %c0_17] : memref<3x64x128xbf16, #tpu.memory_space<vmem>>, vector<1x64x128xbf16>
    %20 = vector.shape_cast %19 : vector<1x64x128xbf16> to vector<64x128xbf16>
    %cst_18 = arith.constant dense<0.000000e+00> : vector<34x128xf32>
    %21 = tpu.matmul %18, %20, %cst_18 {dimension_numbers = #tpu.dot_dimension_numbers<[1], [0], [0], [1], [0, 0, 1, 1], [], []>} : vector<34x64xbf16>, vector<64x128xbf16>, vector<34x128xf32> -> vector<34x128xf32>
    %22 = arith.addf %17, %21 : vector<34x128xf32>
    %23 = vector.extract_strided_slice %13 {offsets = [2, 0], sizes = [34, 64], strides = [1, 1]} : vector<36x64xbf16> to vector<34x64xbf16>
    %c2 = arith.constant 2 : index
    %c0_19 = arith.constant 0 : index
    %c0_20 = arith.constant 0 : index
    %24 = vector.load %arg2[%c2, %c0_19, %c0_20] : memref<3x64x128xbf16, #tpu.memory_space<vmem>>, vector<1x64x128xbf16>
    %25 = vector.shape_cast %24 : vector<1x64x128xbf16> to vector<64x128xbf16>
    %cst_21 = arith.constant dense<0.000000e+00> : vector<34x128xf32>
    %26 = tpu.matmul %23, %25, %cst_21 {dimension_numbers = #tpu.dot_dimension_numbers<[1], [0], [0], [1], [0, 0, 1, 1], [], []>} : vector<34x64xbf16>, vector<64x128xbf16>, vector<34x128xf32> -> vector<34x128xf32>
    %27 = arith.addf %22, %26 : vector<34x128xf32>
    %cst_22 = arith.constant 0.000000e+00 : f32
    %28 = vector.broadcast %cst_22 : f32 to vector<1x128xf32>
    %cst_23 = arith.constant 0.000000e+00 : f32
    %29 = vector.broadcast %cst_23 : f32 to vector<1x128xf32>
    %30 = vector.extract_strided_slice %27 {offsets = [0, 0], sizes = [16, 128], strides = [1, 1]} : vector<34x128xf32> to vector<16x128xf32>
    %c0_24 = arith.constant 0 : index
    %c0_25 = arith.constant 0 : index
    %c0_26 = arith.constant 0 : index
    %31 = vector.load %arg5[%c0_24, %c0_25, %c0_26] : memref<2x16x128xf32, #tpu.memory_space<vmem>>, vector<1x16x128xf32>
    %32 = vector.shape_cast %31 : vector<1x16x128xf32> to vector<16x128xf32>
    %33 = vector.shape_cast %30 : vector<16x128xf32> to vector<1x16x128xf32>
    tpu.vector_store %arg5[%c0_24, %c0_25, %c0_26], %33 {strides = array<i32>} : memref<2x16x128xf32, #tpu.memory_space<vmem>>, vector<1x16x128xf32>,
    %cst_27 = arith.constant dense<0.000000e+00> : vector<128xf32>
    %34 = vector.multi_reduction <add>, %30, %cst_27 [0] : vector<16x128xf32> to vector<128xf32>
    %35 = vector.shape_cast %34 : vector<128xf32> to vector<1x128xf32>
    %36 = arith.addf %28, %35 : vector<1x128xf32>
    %37 = arith.mulf %30, %30 : vector<16x128xf32>
    %cst_28 = arith.constant dense<0.000000e+00> : vector<128xf32>
    %38 = vector.multi_reduction <add>, %37, %cst_28 [0] : vector<16x128xf32> to vector<128xf32>
    %39 = vector.shape_cast %38 : vector<128xf32> to vector<1x128xf32>
    %40 = arith.addf %29, %39 : vector<1x128xf32>
    %41 = vector.extract_strided_slice %27 {offsets = [18, 0], sizes = [16, 128], strides = [1, 1]} : vector<34x128xf32> to vector<16x128xf32>
    %c1_29 = arith.constant 1 : index
    %c0_30 = arith.constant 0 : index
    %c0_31 = arith.constant 0 : index
    %42 = vector.load %arg5[%c1_29, %c0_30, %c0_31] : memref<2x16x128xf32, #tpu.memory_space<vmem>>, vector<1x16x128xf32>
    %43 = vector.shape_cast %42 : vector<1x16x128xf32> to vector<16x128xf32>
    %44 = vector.shape_cast %41 : vector<16x128xf32> to vector<1x16x128xf32>
    tpu.vector_store %arg5[%c1_29, %c0_30, %c0_31], %44 {strides = array<i32>} : memref<2x16x128xf32, #tpu.memory_space<vmem>>, vector<1x16x128xf32>,
    %cst_32 = arith.constant dense<0.000000e+00> : vector<128xf32>
    %45 = vector.multi_reduction <add>, %41, %cst_32 [0] : vector<16x128xf32> to vector<128xf32>
    %46 = vector.shape_cast %45 : vector<128xf32> to vector<1x128xf32>
    %47 = arith.addf %36, %46 : vector<1x128xf32>
    %48 = arith.mulf %41, %41 : vector<16x128xf32>
    %cst_33 = arith.constant dense<0.000000e+00> : vector<128xf32>
    %49 = vector.multi_reduction <add>, %48, %cst_33 [0] : vector<16x128xf32> to vector<128xf32>
    %50 = vector.shape_cast %49 : vector<128xf32> to vector<1x128xf32>
    %51 = arith.addf %40, %50 : vector<1x128xf32>
    %c0_34 = arith.constant 0 : index
    %c0_35 = arith.constant 0 : index
    %c0_36 = arith.constant 0 : index
    %52 = vector.load %arg6[%c0_34, %c0_35, %c0_36] : memref<1x2x128xf32, #tpu.memory_space<vmem>>, vector<1x1x128xf32>
    %53 = vector.shape_cast %52 : vector<1x1x128xf32> to vector<1x128xf32>
    %54 = vector.shape_cast %47 : vector<1x128xf32> to vector<1x1x128xf32>
    tpu.vector_store %arg6[%c0_34, %c0_35, %c0_36], %54 {strides = array<i32>} : memref<1x2x128xf32, #tpu.memory_space<vmem>>, vector<1x1x128xf32>,
    %c0_37 = arith.constant 0 : index
    %c1_38 = arith.constant 1 : index
    %c0_39 = arith.constant 0 : index
    %55 = vector.load %arg6[%c0_37, %c1_38, %c0_39] : memref<1x2x128xf32, #tpu.memory_space<vmem>>, vector<1x1x128xf32>
    %56 = vector.shape_cast %55 : vector<1x1x128xf32> to vector<1x128xf32>
    %57 = vector.shape_cast %51 : vector<1x128xf32> to vector<1x1x128xf32>
    tpu.vector_store %arg6[%c0_37, %c1_38, %c0_39], %57 {strides = array<i32>} : memref<1x2x128xf32, #tpu.memory_space<vmem>>, vector<1x1x128xf32>,
    return
  }
  func.func @transform_0(%arg0: i32) -> (i32, i32, i32) {
    %c0_i32 = arith.constant 0 : i32
    %c0_i32_0 = arith.constant 0 : i32
    %c0_i32_1 = arith.constant 0 : i32
    return %arg0, %c0_i32, %c0_i32_0 : i32, i32, i32
  }
  func.func @transform_1(%arg0: i32) -> (i32, i32, i32) {
    %c0_i32 = arith.constant 0 : i32
    %c0_i32_0 = arith.constant 0 : i32
    %c0_i32_1 = arith.constant 0 : i32
    %c0_i32_2 = arith.constant 0 : i32
    return %c0_i32, %c0_i32_0, %c0_i32_1 : i32, i32, i32
  }
  func.func @transform_2(%arg0: i32) -> (i32, i32) {
    %c0_i32 = arith.constant 0 : i32
    %c0_i32_0 = arith.constant 0 : i32
    %c0_i32_1 = arith.constant 0 : i32
    return %c0_i32, %c0_i32_0 : i32, i32
  }
  func.func @transform_3(%arg0: i32) -> (i32, i32) {
    %c0_i32 = arith.constant 0 : i32
    %c0_i32_0 = arith.constant 0 : i32
    %c0_i32_1 = arith.constant 0 : i32
    return %c0_i32, %c0_i32_0 : i32, i32
  }
  func.func @transform_4(%arg0: i32) -> (i32, i32, i32) {
    %c0_i32 = arith.constant 0 : i32
    %c0_i32_0 = arith.constant 0 : i32
    %c0_i32_1 = arith.constant 0 : i32
    return %arg0, %c0_i32, %c0_i32_0 : i32, i32, i32
  }
  func.func @transform_5(%arg0: i32) -> (i32, i32, i32) {
    %c0_i32 = arith.constant 0 : i32
    %c0_i32_0 = arith.constant 0 : i32
    %c0_i32_1 = arith.constant 0 : i32
    return %arg0, %c0_i32, %c0_i32_0 : i32, i32, i32
  }
}

module attributes {stable_mosaic.version = 11 : i64} {
  func.func @_conv_bn_stats_kernel(%arg0: i32, %arg1: memref<2x16x128xf32, #tpu.memory_space<vmem>>, %arg2: memref<3x128x128xbf16, #tpu.memory_space<vmem>>, %arg3: memref<1x128xf32, #tpu.memory_space<vmem>>, %arg4: memref<1x128xf32, #tpu.memory_space<vmem>>, %arg5: memref<2x16x128xf32, #tpu.memory_space<vmem>>, %arg6: memref<1x2x128xf32, #tpu.memory_space<vmem>>, %arg7: memref<36x128xf32, #tpu.memory_space<vmem>>) attributes {dimension_semantics = [#tpu.dimension_semantics<parallel>], iteration_bounds = array<i64: 1>, scalar_prefetch = 0 : i64, scratch_operands = 1 : i64, tpu.core_type = #tpu.core_type<tc>, window_params = [{transform_indices = @transform_0, window_bounds = array<i64: 2, 16, 128>}, {pipeline_mode = #tpu.pipeline_mode<synchronous>, transform_indices = @transform_1, window_bounds = array<i64: 3, 128, 128>}, {pipeline_mode = #tpu.pipeline_mode<synchronous>, transform_indices = @transform_2, window_bounds = array<i64: 1, 128>}, {pipeline_mode = #tpu.pipeline_mode<synchronous>, transform_indices = @transform_3, window_bounds = array<i64: 1, 128>}, {transform_indices = @transform_4, window_bounds = array<i64: 2, 16, 128>}, {transform_indices = @transform_5, window_bounds = array<i64: 1, 2, 128>}]} {
    %c0 = arith.constant 0 : index
    %c0_0 = arith.constant 0 : index
    %c0_1 = arith.constant 0 : index
    %0 = vector.load %arg1[%c0, %c0_0, %c0_1] : memref<2x16x128xf32, #tpu.memory_space<vmem>>, vector<2x16x128xf32>
    %c0_2 = arith.constant 0 : index
    %c0_3 = arith.constant 0 : index
    %1 = vector.load %arg3[%c0_2, %c0_3] : memref<1x128xf32, #tpu.memory_space<vmem>>, vector<1x128xf32>
    %2 = vector.shape_cast %1 : vector<1x128xf32> to vector<1x1x128xf32>
    %3 = vector.broadcast %2 : vector<1x1x128xf32> to vector<2x16x128xf32>
    %4 = arith.mulf %0, %3 : vector<2x16x128xf32>
    %c0_4 = arith.constant 0 : index
    %c0_5 = arith.constant 0 : index
    %5 = vector.load %arg4[%c0_4, %c0_5] : memref<1x128xf32, #tpu.memory_space<vmem>>, vector<1x128xf32>
    %6 = vector.shape_cast %5 : vector<1x128xf32> to vector<1x1x128xf32>
    %7 = vector.broadcast %6 : vector<1x1x128xf32> to vector<2x16x128xf32>
    %8 = arith.addf %4, %7 : vector<2x16x128xf32>
    %cst = arith.constant 0.000000e+00 : f32
    %9 = vector.broadcast %cst : f32 to vector<2x16x128xf32>
    %10 = arith.maximumf %8, %9 : vector<2x16x128xf32>
    %cst_6 = arith.constant 0.000000e+00 : f32
    %11 = vector.broadcast %cst_6 : f32 to vector<1x128xf32>
    %c0_7 = arith.constant 0 : index
    %c0_8 = arith.constant 0 : index
    %12 = vector.load %arg7[%c0_7, %c0_8] : memref<36x128xf32, #tpu.memory_space<vmem>>, vector<1x128xf32>
    tpu.vector_store %arg7[%c0_7, %c0_8], %11 {strides = array<i32>} : memref<36x128xf32, #tpu.memory_space<vmem>>, vector<1x128xf32>,
    %c17 = arith.constant 17 : index
    %c0_9 = arith.constant 0 : index
    %13 = vector.load %arg7[%c17, %c0_9] : memref<36x128xf32, #tpu.memory_space<vmem>>, vector<1x128xf32>
    tpu.vector_store %arg7[%c17, %c0_9], %11 {strides = array<i32>} : memref<36x128xf32, #tpu.memory_space<vmem>>, vector<1x128xf32>,
    %14 = vector.extract_strided_slice %10 {offsets = [0, 0, 0], sizes = [1, 16, 128], strides = [1, 1, 1]} : vector<2x16x128xf32> to vector<1x16x128xf32>
    %15 = vector.shape_cast %14 : vector<1x16x128xf32> to vector<16x128xf32>
    %c1 = arith.constant 1 : index
    %c0_10 = arith.constant 0 : index
    %16 = vector.load %arg7[%c1, %c0_10] : memref<36x128xf32, #tpu.memory_space<vmem>>, vector<16x128xf32>
    tpu.vector_store %arg7[%c1, %c0_10], %15 {strides = array<i32>} : memref<36x128xf32, #tpu.memory_space<vmem>>, vector<16x128xf32>,
    %c18 = arith.constant 18 : index
    %c0_11 = arith.constant 0 : index
    %17 = vector.load %arg7[%c18, %c0_11] : memref<36x128xf32, #tpu.memory_space<vmem>>, vector<1x128xf32>
    tpu.vector_store %arg7[%c18, %c0_11], %11 {strides = array<i32>} : memref<36x128xf32, #tpu.memory_space<vmem>>, vector<1x128xf32>,
    %c35 = arith.constant 35 : index
    %c0_12 = arith.constant 0 : index
    %18 = vector.load %arg7[%c35, %c0_12] : memref<36x128xf32, #tpu.memory_space<vmem>>, vector<1x128xf32>
    tpu.vector_store %arg7[%c35, %c0_12], %11 {strides = array<i32>} : memref<36x128xf32, #tpu.memory_space<vmem>>, vector<1x128xf32>,
    %19 = vector.extract_strided_slice %10 {offsets = [1, 0, 0], sizes = [1, 16, 128], strides = [1, 1, 1]} : vector<2x16x128xf32> to vector<1x16x128xf32>
    %20 = vector.shape_cast %19 : vector<1x16x128xf32> to vector<16x128xf32>
    %c19 = arith.constant 19 : index
    %c0_13 = arith.constant 0 : index
    %21 = vector.load %arg7[%c19, %c0_13] : memref<36x128xf32, #tpu.memory_space<vmem>>, vector<16x128xf32>
    tpu.vector_store %arg7[%c19, %c0_13], %20 {strides = array<i32>} : memref<36x128xf32, #tpu.memory_space<vmem>>, vector<16x128xf32>,
    %c0_14 = arith.constant 0 : index
    %c0_15 = arith.constant 0 : index
    %22 = vector.load %arg7[%c0_14, %c0_15] : memref<36x128xf32, #tpu.memory_space<vmem>>, vector<36x128xf32>
    %23 = arith.truncf %22 : vector<36x128xf32> to vector<36x128xbf16>
    %24 = vector.extract_strided_slice %23 {offsets = [0, 0], sizes = [34, 128], strides = [1, 1]} : vector<36x128xbf16> to vector<34x128xbf16>
    %c0_16 = arith.constant 0 : index
    %c0_17 = arith.constant 0 : index
    %c0_18 = arith.constant 0 : index
    %25 = vector.load %arg2[%c0_16, %c0_17, %c0_18] : memref<3x128x128xbf16, #tpu.memory_space<vmem>>, vector<1x128x128xbf16>
    %26 = vector.shape_cast %25 : vector<1x128x128xbf16> to vector<128x128xbf16>
    %cst_19 = arith.constant dense<0.000000e+00> : vector<34x128xf32>
    %27 = tpu.matmul %24, %26, %cst_19 {dimension_numbers = #tpu.dot_dimension_numbers<[1], [0], [0], [1], [0, 0, 1, 1], [], []>} : vector<34x128xbf16>, vector<128x128xbf16>, vector<34x128xf32> -> vector<34x128xf32>
    %28 = vector.extract_strided_slice %23 {offsets = [1, 0], sizes = [34, 128], strides = [1, 1]} : vector<36x128xbf16> to vector<34x128xbf16>
    %c1_20 = arith.constant 1 : index
    %c0_21 = arith.constant 0 : index
    %c0_22 = arith.constant 0 : index
    %29 = vector.load %arg2[%c1_20, %c0_21, %c0_22] : memref<3x128x128xbf16, #tpu.memory_space<vmem>>, vector<1x128x128xbf16>
    %30 = vector.shape_cast %29 : vector<1x128x128xbf16> to vector<128x128xbf16>
    %cst_23 = arith.constant dense<0.000000e+00> : vector<34x128xf32>
    %31 = tpu.matmul %28, %30, %cst_23 {dimension_numbers = #tpu.dot_dimension_numbers<[1], [0], [0], [1], [0, 0, 1, 1], [], []>} : vector<34x128xbf16>, vector<128x128xbf16>, vector<34x128xf32> -> vector<34x128xf32>
    %32 = arith.addf %27, %31 : vector<34x128xf32>
    %33 = vector.extract_strided_slice %23 {offsets = [2, 0], sizes = [34, 128], strides = [1, 1]} : vector<36x128xbf16> to vector<34x128xbf16>
    %c2 = arith.constant 2 : index
    %c0_24 = arith.constant 0 : index
    %c0_25 = arith.constant 0 : index
    %34 = vector.load %arg2[%c2, %c0_24, %c0_25] : memref<3x128x128xbf16, #tpu.memory_space<vmem>>, vector<1x128x128xbf16>
    %35 = vector.shape_cast %34 : vector<1x128x128xbf16> to vector<128x128xbf16>
    %cst_26 = arith.constant dense<0.000000e+00> : vector<34x128xf32>
    %36 = tpu.matmul %33, %35, %cst_26 {dimension_numbers = #tpu.dot_dimension_numbers<[1], [0], [0], [1], [0, 0, 1, 1], [], []>} : vector<34x128xbf16>, vector<128x128xbf16>, vector<34x128xf32> -> vector<34x128xf32>
    %37 = arith.addf %32, %36 : vector<34x128xf32>
    %cst_27 = arith.constant 0.000000e+00 : f32
    %38 = vector.broadcast %cst_27 : f32 to vector<1x128xf32>
    %cst_28 = arith.constant 0.000000e+00 : f32
    %39 = vector.broadcast %cst_28 : f32 to vector<1x128xf32>
    %40 = vector.extract_strided_slice %37 {offsets = [0, 0], sizes = [16, 128], strides = [1, 1]} : vector<34x128xf32> to vector<16x128xf32>
    %c0_29 = arith.constant 0 : index
    %c0_30 = arith.constant 0 : index
    %c0_31 = arith.constant 0 : index
    %41 = vector.load %arg5[%c0_29, %c0_30, %c0_31] : memref<2x16x128xf32, #tpu.memory_space<vmem>>, vector<1x16x128xf32>
    %42 = vector.shape_cast %41 : vector<1x16x128xf32> to vector<16x128xf32>
    %43 = vector.shape_cast %40 : vector<16x128xf32> to vector<1x16x128xf32>
    tpu.vector_store %arg5[%c0_29, %c0_30, %c0_31], %43 {strides = array<i32>} : memref<2x16x128xf32, #tpu.memory_space<vmem>>, vector<1x16x128xf32>,
    %cst_32 = arith.constant dense<0.000000e+00> : vector<128xf32>
    %44 = vector.multi_reduction <add>, %40, %cst_32 [0] : vector<16x128xf32> to vector<128xf32>
    %45 = vector.shape_cast %44 : vector<128xf32> to vector<1x128xf32>
    %46 = arith.addf %38, %45 : vector<1x128xf32>
    %47 = arith.mulf %40, %40 : vector<16x128xf32>
    %cst_33 = arith.constant dense<0.000000e+00> : vector<128xf32>
    %48 = vector.multi_reduction <add>, %47, %cst_33 [0] : vector<16x128xf32> to vector<128xf32>
    %49 = vector.shape_cast %48 : vector<128xf32> to vector<1x128xf32>
    %50 = arith.addf %39, %49 : vector<1x128xf32>
    %51 = vector.extract_strided_slice %37 {offsets = [18, 0], sizes = [16, 128], strides = [1, 1]} : vector<34x128xf32> to vector<16x128xf32>
    %c1_34 = arith.constant 1 : index
    %c0_35 = arith.constant 0 : index
    %c0_36 = arith.constant 0 : index
    %52 = vector.load %arg5[%c1_34, %c0_35, %c0_36] : memref<2x16x128xf32, #tpu.memory_space<vmem>>, vector<1x16x128xf32>
    %53 = vector.shape_cast %52 : vector<1x16x128xf32> to vector<16x128xf32>
    %54 = vector.shape_cast %51 : vector<16x128xf32> to vector<1x16x128xf32>
    tpu.vector_store %arg5[%c1_34, %c0_35, %c0_36], %54 {strides = array<i32>} : memref<2x16x128xf32, #tpu.memory_space<vmem>>, vector<1x16x128xf32>,
    %cst_37 = arith.constant dense<0.000000e+00> : vector<128xf32>
    %55 = vector.multi_reduction <add>, %51, %cst_37 [0] : vector<16x128xf32> to vector<128xf32>
    %56 = vector.shape_cast %55 : vector<128xf32> to vector<1x128xf32>
    %57 = arith.addf %46, %56 : vector<1x128xf32>
    %58 = arith.mulf %51, %51 : vector<16x128xf32>
    %cst_38 = arith.constant dense<0.000000e+00> : vector<128xf32>
    %59 = vector.multi_reduction <add>, %58, %cst_38 [0] : vector<16x128xf32> to vector<128xf32>
    %60 = vector.shape_cast %59 : vector<128xf32> to vector<1x128xf32>
    %61 = arith.addf %50, %60 : vector<1x128xf32>
    %c0_39 = arith.constant 0 : index
    %c0_40 = arith.constant 0 : index
    %c0_41 = arith.constant 0 : index
    %62 = vector.load %arg6[%c0_39, %c0_40, %c0_41] : memref<1x2x128xf32, #tpu.memory_space<vmem>>, vector<1x1x128xf32>
    %63 = vector.shape_cast %62 : vector<1x1x128xf32> to vector<1x128xf32>
    %64 = vector.shape_cast %57 : vector<1x128xf32> to vector<1x1x128xf32>
    tpu.vector_store %arg6[%c0_39, %c0_40, %c0_41], %64 {strides = array<i32>} : memref<1x2x128xf32, #tpu.memory_space<vmem>>, vector<1x1x128xf32>,
    %c0_42 = arith.constant 0 : index
    %c1_43 = arith.constant 1 : index
    %c0_44 = arith.constant 0 : index
    %65 = vector.load %arg6[%c0_42, %c1_43, %c0_44] : memref<1x2x128xf32, #tpu.memory_space<vmem>>, vector<1x1x128xf32>
    %66 = vector.shape_cast %65 : vector<1x1x128xf32> to vector<1x128xf32>
    %67 = vector.shape_cast %61 : vector<1x128xf32> to vector<1x1x128xf32>
    tpu.vector_store %arg6[%c0_42, %c1_43, %c0_44], %67 {strides = array<i32>} : memref<1x2x128xf32, #tpu.memory_space<vmem>>, vector<1x1x128xf32>,
    return
  }
  func.func @transform_0(%arg0: i32) -> (i32, i32, i32) {
    %c0_i32 = arith.constant 0 : i32
    %c0_i32_0 = arith.constant 0 : i32
    %c0_i32_1 = arith.constant 0 : i32
    return %arg0, %c0_i32, %c0_i32_0 : i32, i32, i32
  }
  func.func @transform_1(%arg0: i32) -> (i32, i32, i32) {
    %c0_i32 = arith.constant 0 : i32
    %c0_i32_0 = arith.constant 0 : i32
    %c0_i32_1 = arith.constant 0 : i32
    %c0_i32_2 = arith.constant 0 : i32
    return %c0_i32, %c0_i32_0, %c0_i32_1 : i32, i32, i32
  }
  func.func @transform_2(%arg0: i32) -> (i32, i32) {
    %c0_i32 = arith.constant 0 : i32
    %c0_i32_0 = arith.constant 0 : i32
    %c0_i32_1 = arith.constant 0 : i32
    return %c0_i32, %c0_i32_0 : i32, i32
  }
  func.func @transform_3(%arg0: i32) -> (i32, i32) {
    %c0_i32 = arith.constant 0 : i32
    %c0_i32_0 = arith.constant 0 : i32
    %c0_i32_1 = arith.constant 0 : i32
    return %c0_i32, %c0_i32_0 : i32, i32
  }
  func.func @transform_4(%arg0: i32) -> (i32, i32, i32) {
    %c0_i32 = arith.constant 0 : i32
    %c0_i32_0 = arith.constant 0 : i32
    %c0_i32_1 = arith.constant 0 : i32
    return %arg0, %c0_i32, %c0_i32_0 : i32, i32, i32
  }
  func.func @transform_5(%arg0: i32) -> (i32, i32, i32) {
    %c0_i32 = arith.constant 0 : i32
    %c0_i32_0 = arith.constant 0 : i32
    %c0_i32_1 = arith.constant 0 : i32
    return %arg0, %c0_i32, %c0_i32_0 : i32, i32, i32
  }
}

module attributes {stable_mosaic.version = 11 : i64} {
  func.func @_bn_relu_kernel(%arg0: i32, %arg1: memref<32x128xf32, #tpu.memory_space<vmem>>, %arg2: memref<1x128xf32, #tpu.memory_space<vmem>>, %arg3: memref<1x128xf32, #tpu.memory_space<vmem>>, %arg4: memref<32x128xf32, #tpu.memory_space<vmem>>) attributes {dimension_semantics = [#tpu.dimension_semantics<parallel>], iteration_bounds = array<i64: 1>, scalar_prefetch = 0 : i64, scratch_operands = 0 : i64, tpu.core_type = #tpu.core_type<tc>, window_params = [{transform_indices = @transform_0, window_bounds = array<i64: 32, 128>}, {pipeline_mode = #tpu.pipeline_mode<synchronous>, transform_indices = @transform_1, window_bounds = array<i64: 1, 128>}, {pipeline_mode = #tpu.pipeline_mode<synchronous>, transform_indices = @transform_2, window_bounds = array<i64: 1, 128>}, {transform_indices = @transform_3, window_bounds = array<i64: 32, 128>}]} {
    %c0 = arith.constant 0 : index
    %c0_0 = arith.constant 0 : index
    %0 = vector.load %arg1[%c0, %c0_0] : memref<32x128xf32, #tpu.memory_space<vmem>>, vector<32x128xf32>
    %c0_1 = arith.constant 0 : index
    %c0_2 = arith.constant 0 : index
    %1 = vector.load %arg2[%c0_1, %c0_2] : memref<1x128xf32, #tpu.memory_space<vmem>>, vector<1x128xf32>
    %2 = vector.broadcast %1 : vector<1x128xf32> to vector<32x128xf32>
    %3 = arith.mulf %0, %2 : vector<32x128xf32>
    %c0_3 = arith.constant 0 : index
    %c0_4 = arith.constant 0 : index
    %4 = vector.load %arg3[%c0_3, %c0_4] : memref<1x128xf32, #tpu.memory_space<vmem>>, vector<1x128xf32>
    %5 = vector.broadcast %4 : vector<1x128xf32> to vector<32x128xf32>
    %6 = arith.addf %3, %5 : vector<32x128xf32>
    %cst = arith.constant 0.000000e+00 : f32
    %7 = vector.broadcast %cst : f32 to vector<32x128xf32>
    %8 = arith.maximumf %6, %7 : vector<32x128xf32>
    %c0_5 = arith.constant 0 : index
    %c0_6 = arith.constant 0 : index
    %9 = vector.load %arg4[%c0_5, %c0_6] : memref<32x128xf32, #tpu.memory_space<vmem>>, vector<32x128xf32>
    tpu.vector_store %arg4[%c0_5, %c0_6], %8 {strides = array<i32>} : memref<32x128xf32, #tpu.memory_space<vmem>>, vector<32x128xf32>,
    return
  }
  func.func @transform_0(%arg0: i32) -> (i32, i32) {
    %c0_i32 = arith.constant 0 : i32
    %c0_i32_0 = arith.constant 0 : i32
    return %arg0, %c0_i32 : i32, i32
  }
  func.func @transform_1(%arg0: i32) -> (i32, i32) {
    %c0_i32 = arith.constant 0 : i32
    %c0_i32_0 = arith.constant 0 : i32
    %c0_i32_1 = arith.constant 0 : i32
    return %c0_i32, %c0_i32_0 : i32, i32
  }
  func.func @transform_2(%arg0: i32) -> (i32, i32) {
    %c0_i32 = arith.constant 0 : i32
    %c0_i32_0 = arith.constant 0 : i32
    %c0_i32_1 = arith.constant 0 : i32
    return %c0_i32, %c0_i32_0 : i32, i32
  }
  func.func @transform_3(%arg0: i32) -> (i32, i32) {
    %c0_i32 = arith.constant 0 : i32
    %c0_i32_0 = arith.constant 0 : i32
    return %arg0, %c0_i32 : i32, i32
  }
}

</mosaic_0001>

<bundles_post_ra>
// kernel: conv2_forward.3
= control target key start
LH: loop header
LB: loop body
LE: loop exit
PB: predicated region body
PF: predicated region fallthrough
CT: control target
= control target key end

     0   :  { %vm24_vm0 = vcmask 516096   ;;  %v450_v3 = vmov 0.0   ;;  %vm27_vm1 = vcmask 523264   ;;  %vm216_vm2 = vcmask 1046528   ;;  %s569_s1 = inlined_call_operand.vmem [shape: bf16[3,64,128], index: 1, kind: input, shape index: {}]   ;;  %s570_s2 = inlined_call_operand.vmem [shape: f32[1,64], index: 2, kind: input, shape index: {}, may-alias: {2,3}]   ;;  %s571_s3 = inlined_call_operand.vmem [shape: f32[1,64], index: 3, kind: input, shape index: {}, may-alias: {2,3}]   ;;  %s572_s0 = inlined_call_operand.vmem [shape: f32[2,16,64], index: 0, kind: input, shape index: {}]   ;;  %s573_s4 = inlined_call_operand.vmem [shape: f32[2,16,128], index: 4, kind: output, shape index: {0}]   ;;  %s574_s5 = inlined_call_operand.vmem [shape: f32[1,2,128], index: 5, kind: output, shape index: {1}]  }
   0x1   :  { %v436_v0 = vld [vmem:[%s569_s1 + $0x18] sm:$0xff]  ;;  %25 = vst.msk [vmem:[#allocation2] sm:$0x1] %vm24_vm0, %v450_v3  ;;  %v435_v4 = vld [vmem:[%s569_s1 + $0x10] sm:$0xff]  ;;  %v20_v7 = vld [vmem:[%s572_s0] sm:$0xff]  ;;  %vm310_vm4 = vcmask 1045504  }
   0x2   :  { %v444_v1 = vld [vmem:[%s569_s1 + $0x58] sm:$0xff]  ;;  %26 = vst.msk [vmem:[#allocation2 + $0x11] sm:$0x1] %vm24_vm0, %v450_v3  ;;  %188 = vmatpush.bf16.msra.mxu1 %v436_v0  ;;  %v443_v5 = vld [vmem:[%s569_s1 + $0x50] sm:$0xff]  ;;  %v21_v8 = vld [vmem:[%s572_s0 + $0x8] sm:$0xff] }
   0x3   :  { %v440_v2 = vld [vmem:[%s569_s1 + $0x38] sm:$0xff]  ;;  %259 = vmatpush.bf16.msra.mxu2 %v444_v1  ;;  %30 = vst.msk [vmem:[#allocation2 + $0x12] sm:$0x1] %vm24_vm0, %v450_v3  ;;  %v439_v6 = vld [vmem:[%s569_s1 + $0x30] sm:$0xff]  ;;  %v434_v11 = vld [vmem:[%s569_s1 + $0x8] sm:$0xff] }
   0x4   :  { %135 = vmatpush.bf16.msra.mxu0 %v440_v2  ;;  %445 = vmatpush.bf16.msra.mxu3 %v440_v2  ;;  %31 = vst.msk [vmem:[#allocation2 + $0x23] sm:$0x1] %vm24_vm0, %v450_v3  ;;  %v22_v9 = vld [vmem:[%s572_s0 + $0x10] sm:$0xff]  ;;  %v23_v10 = vld [vmem:[%s572_s0 + $0x18] sm:$0xff]  ;;  %v442_v12 = vld [vmem:[%s569_s1 + $0x48] sm:$0xff] }
   0x5   :  { %28 = vst.msk [vmem:[#allocation2 + $0x1] sm:$0xff] %vm27_vm1, %v20_v7  ;;  %v438_v13 = vld [vmem:[%s569_s1 + $0x28] sm:$0xff]  ;;  %v433_v14 = vld [vmem:[%s569_s1] sm:$0xff]  ;;  %vm74_vm3 = vsmask.f32 7424 }
   0x6   :  { %29 = vst.msk [vmem:[#allocation2 + $0x9] sm:$0xff] %vm27_vm1, %v21_v8  ;;  %189 = vmatpush.bf16.msra.mxu1 %v435_v4  ;;  %v441_v15 = vld [vmem:[%s569_s1 + $0x40] sm:$0xff] }
   0x7   :  { %260 = vmatpush.bf16.msra.mxu2 %v443_v5  ;;  %32 = vst.msk [vmem:[#allocation2 + $0x13] sm:$0xff] %vm27_vm1, %v22_v9  ;;  %v437_v17 = vld [vmem:[%s569_s1 + $0x20] sm:$0xff] }
   0x8   :  { %136 = vmatpush.bf16.msra.mxu0 %v439_v6  ;;  %446 = vmatpush.bf16.msra.mxu3 %v439_v6  ;;  %33 = vst.msk [vmem:[#allocation2 + $0x1b] sm:$0xff] %vm27_vm1, %v23_v10 }
   0xa   :  { %190 = vmatpush.bf16.msra.mxu1 %v434_v11 }
   0xb   :  { %261 = vmatpush.bf16.msra.mxu2 %v442_v12 }
   0xc   :  { %137 = vmatpush.bf16.msra.mxu0 %v438_v13  ;;  %447 = vmatpush.bf16.msra.mxu3 %v438_v13  ;;  %v34_v16 = vld [vmem:[#allocation2] sm:$0xff] }
   0xd   :  { %v35_v18 = vld [vmem:[#allocation2 + $0x8] sm:$0xff]  ;;  %v39_v19 = vpack.c.bf16 %v34_v16, %v34_v16 }
   0xe   :  { %v40_v20 = vpack.c.bf16 %v35_v18, %v35_v18  ;;  %v36_v21 = vld [vmem:[#allocation2 + $0x10] sm:$0xff]  ;;  %191 = vmatpush.bf16.msra.mxu1 %v433_v14 }
   0xf   :  { %262 = vmatpush.bf16.msra.mxu2 %v441_v15  ;;  %v66_v22 = vunpack.c.l.b16 %v39_v19  ;;  %v37_v23 = vld [vmem:[#allocation2 + $0x18] sm:$0xff]  ;;  %v41_v24 = vpack.c.bf16 %v36_v21, %v36_v21  ;;  %v38_v25 = vld [vmem:[#allocation2 + $0x20] sm:$0xf] }
  0x10   :  { %v67_v26 = vunpack.c.l.b16 %v40_v20  ;;  %v42_v27 = vpack.c.bf16 %v37_v23, %v37_v23  ;;  %138 = vmatpush.bf16.msra.mxu0 %v437_v17  ;;  %448 = vmatpush.bf16.msra.mxu3 %v437_v17  ;;  %v43_v28 = vpack.c.bf16 %v38_v25, %v38_v25 }
  0x11   :  { %v68_v29 = vunpack.c.l.b16 %v41_v24 }
  0x12   :  { %v71_v30 = vpack.c.b16 %v67_v26, %v66_v22  ;;  %v69_v31 = vunpack.c.l.b16 %v42_v27  ;;  %v70_v32 = vunpack.c.l.b16 %v43_v28 }
  0x14   :  { %400 = vmatmul.msk.bf16.vlgmr.msra.gmra.mxu1 %vm27_vm1, %v71_v30  ;;  %v72_v33 = vpack.c.b16 %v69_v31, %v68_v29  ;;  %v217_v34 = vrot.slane %v71_v30, 1  ;;  %v76_v35 = vshrl.u32 %v71_v30, 16  ;;  %v78_v36 = vshll.u32 %v71_v30, 16 }
  0x15   :  { %v73_v37 = vpack.c.b16 %v70_v32, %v70_v32 }
  0x16   :  { %v218_v38 = vrot.slane %v72_v33, 1  ;;  %v80_v39 = vrot.slane %v78_v36, 1  ;;  %v83_v40 = vshll.u32 %v72_v33, 16  ;;  %v87_v41 = vshrl.u32 %v72_v33, 16 }
  0x17   :  { %v91_v42 = vshll.u32 %v73_v37, 16  ;;  %v220_v50 = vrot.slane %v73_v37, 1  ;;  %v95_v51 = vshrl.u32 %v73_v37, 16 }
  0x18   :  { %v219_v43 = vsel %vm216_vm2, %v217_v34, %v218_v38  ;;  %v81_v44 = vor.u32 %v80_v39, %v76_v35  ;;  %v85_v45 = vrot.slane %v83_v40, 1 }
  0x19   :  { %427 = vmatmul.msk.bf16.vlgmr.msra.gmra.mxu2 %vm27_vm1, %v219_v43  ;;  %v93_v46 = vrot.slane %v91_v42, 1  ;;  %v221_v52 = vsel %vm216_vm2, %v218_v38, %v220_v50 }
  0x1a   :  { %v86_v47 = vsel %vm74_vm3, %v81_v44, %v85_v45  ;;  %v89_v48 = vor.u32 %v87_v41, %v85_v45 }
  0x1b   :  { %381 = vmatmul.msk.bf16.vlgmr.msra.gmra.mxu0 %vm27_vm1, %v86_v47  ;;  %v97_v53 = vor.u32 %v95_v51, %v93_v46 }
  0x1c   :  { %v94_v49 = vsel %vm74_vm3, %v89_v48, %v93_v46 }
  0x1d   :  { %382 = vmatmul.msk.bf16.vlgmr.msra.gmra.mxu3 %vm27_vm1, %v94_v49 }
  0x24   :  { %401 = vmatmul.msk.bf16.gmra.mxu1 %vm27_vm1, %v72_v33 }
  0x29   :  { %428 = vmatmul.msk.bf16.gmra.mxu2 %vm27_vm1, %v221_v52 }
  0x2d   :  { %383 = vmatmul.msk.bf16.gmra.mxu3 %vm27_vm1, %v97_v53 }
  0x34   :  { %402 = vmatmul.msk.bf16.gmra.mxu1 %vm27_vm1, %v73_v37 }
  0x39   :  { %429 = vmatmul.msk.bf16.gmra.mxu2 %vm27_vm1, %v220_v50 }
  0x91   :  { %v193_v54 = vpop.f32.mrf.mxu1 }
  0x98   :  { %v140_v55 = vpop.f32.mrf.mxu0 }
  0x99   :  { %v194_v56 = vadd.f32 %v193_v54, %v140_v55  ;;  %v195_v57 = vpop.f32.mrf.mxu1 }
  0x9c   :  { %v264_v58 = vpop.f32.mrf.mxu2 }
  0x9d   :  { %v278_v59 = vadd.f32 %v264_v58, %v194_v56 }
  0x9f   :  { %283 = vst [vmem:[%s573_s4] sm:$0xff] %v278_v59  ;;  %v293_v13 = vmul.f32 %v278_v59, %v278_v59 }
  0xa0   :  { %v142_v60 = vpop.f32.mrf.mxu0  ;;  %v145_v61 = vpop.f32.mrf.mxu3 }
  0xa1   :  { %v196_v62 = vadd.f32 %v195_v57, %v142_v60  ;;  %v198_v63 = vpop.f32.mrf.mxu1 }
  0xa2   :  { %v199_v3 = vadd.f32 %v198_v63, %v145_v61 }
  0xa4   :  { %v266_v0 = vpop.f32.mrf.mxu2 }
  0xa5   :  { %v279_v1 = vadd.f32 %v266_v0, %v196_v62 }
  0xa7   :  { %284 = vst [vmem:[%s573_s4 + $0x8] sm:$0xff] %v279_v1  ;;  %v294_v10 = vmul.f32 %v279_v1, %v279_v1  ;;  %v285_v14 = vadd.f32 %v279_v1, %v278_v59 }
  0xa8   :  { %v147_v2 = vpop.f32.mrf.mxu3 }
  0xa9   :  { %v200_v4 = vpop.f32.mrf.mxu1  ;;  %v295_v15 = vadd.f32 %v294_v10, %v293_v13  ;;  %v286_v19 = vrot.slane %v285_v14, 4 }
  0xaa   :  { %v201_v9 = vadd.f32 %v200_v4, %v147_v2 }
  0xab   :  { %v296_v21 = vrot.slane %v295_v15, 4  ;;  %v287_v26 = vadd.f32 %v286_v19, %v285_v14 }
  0xac   :  { %v269_v5 = vpop.f32.mrf.mxu2 }
  0xad   :  { %v280_v6 = vadd.f32 %v269_v5, %v199_v3  ;;  %v297_v31 = vadd.f32 %v296_v21, %v295_v15  ;;  %v288_v36 = vrot.slane %v287_v26, 2 }
  0xaf   :  { %430 = vst [vmem:[%s573_s4 + $0xe] sm:$0xfc] %v280_v6  ;;  %v326_v23 = vmul.f32 %v280_v6, %v280_v6  ;;  %v311_v27 = vrot.slane %v280_v6, 2  ;;  %v298_v40 = vrot.slane %v297_v31, 2  ;;  %v289_v44 = vadd.f32 %v288_v36, %v287_v26 }
  0xb0   :  { %v150_v7 = vpop.f32.mrf.mxu3 }
  0xb1   :  { %v203_v8 = vpop.f32.mrf.mxu1  ;;  %v332_v32 = vrot.slane %v326_v23, 2  ;;  %v299_v47 = vadd.f32 %v298_v40, %v297_v31  ;;  %v290_v50 = vrot.slane %v289_v44, 1 }
  0xb2   :  { %v204_v17 = vadd.f32 %v203_v8, %v150_v7 }
  0xb3   :  { %v300_v53 = vrot.slane %v299_v47, 1  ;;  %v291_v56 = vadd.f32 %v290_v50, %v289_v44 }
  0xb4   :  { %v271_v11 = vpop.f32.mrf.mxu2 }
  0xb5   :  { %v281_v12 = vadd.f32 %v271_v11, %v201_v9  ;;  %v301_v59 = vadd.f32 %v300_v53, %v299_v47 }
  0xb7   :  { %431 = vst [vmem:[%s573_s4 + $0x16] sm:$0xff] %v281_v12  ;;  %v327_v20 = vmul.f32 %v281_v12, %v281_v12  ;;  %v312_v24 = vrot.slane %v281_v12, 2 }
  0xb8   :  { %v152_v16 = vpop.f32.mrf.mxu3 }
  0xb9   :  { %v205_v18 = vpop.f32.mrf.mxu1  ;;  %v333_v28 = vrot.slane %v327_v20, 2  ;;  %v313_v33 = vsel %vm310_vm4, %v311_v27, %v312_v24 }
  0xbb   :  { %v334_v38 = vsel %vm310_vm4, %v332_v32, %v333_v28 }
  0xbc   :  { %v274_v22 = vpop.f32.mrf.mxu2 }
  0xbd   :  { %v282_v25 = vadd.f32 %v274_v22, %v204_v17 }
  0xbf   :  { %432 = vst [vmem:[%s573_s4 + $0x1e] sm:$0x3] %v282_v25  ;;  %v314_v29 = vrot.slane %v282_v25, 2  ;;  %v328_v30 = vmul.f32 %v282_v25, %v282_v25 }
  0xc1   :  { %v315_v34 = vsel %vm310_vm4, %v312_v24, %v314_v29  ;;  %v335_v35 = vrot.slane %v328_v30, 2 }
  0xc2   :  { %v318_v37 = vadd.f32 %v315_v34, %v313_v33 }
  0xc3   :  { %v336_v39 = vsel %vm310_vm4, %v333_v28, %v335_v35 }
  0xc4   :  { %v319_v41 = vrot.slane %v318_v37, 4  ;;  %v339_v42 = vadd.f32 %v336_v39, %v334_v38  ;;  %v276_v43 = vpop.f32.mrf.mxu2 }
  0xc6   :  { %v320_v45 = vadd.f32 %v319_v41, %v318_v37  ;;  %v340_v46 = vrot.slane %v339_v42, 4 }
  0xc8   :  { %v321_v48 = vrot.slane %v320_v45, 2  ;;  %v341_v49 = vadd.f32 %v340_v46, %v339_v42 }
  0xca   :  { %v322_v51 = vadd.f32 %v321_v48, %v320_v45  ;;  %v342_v52 = vrot.slane %v341_v49, 2 }
  0xcc   :  { %v323_v54 = vrot.slane %v322_v51, 1  ;;  %v343_v55 = vadd.f32 %v342_v52, %v341_v49 }
  0xce   :  { %v324_v57 = vadd.f32 %v323_v54, %v322_v51  ;;  %v344_v58 = vrot.slane %v343_v55, 1 }
  0xd0   :  { %v325_v60 = vadd.f32 %v324_v57, %v291_v56  ;;  %v345_v61 = vadd.f32 %v344_v58, %v343_v55 }
  0xd2   :  { %v346_v62 = vadd.f32 %v345_v61, %v301_v59  ;;  %347 = vst [vmem:[%s574_s5] sm:$0x1] %v325_v60 }
  0xd4   :  { %348 = vst [vmem:[%s574_s5 + $0x1] sm:$0x1] %v346_v62 }

// kernel: tile.28
= control target key start
LH: loop header
LB: loop body
LE: loop exit
PB: predicated region body
PF: predicated region fallthrough
CT: control target
= control target key end

     0   :  { %s28_s0 = inlined_call_operand.vmem [shape: f32[8], index: 0, kind: input, shape index: {}]   ;;  %s29_s1 = inlined_call_operand.vmem [shape: f32[16,8], index: 1, kind: output, shape index: {}]  }
   0x1   :  { %v4_v0 = vld [vmem:[%s28_s0] ss:$0 sm:$0xff] }
   0x2   :  { %5 = vst [vmem:[%s29_s1] sm:$0xff] %v4_v0 }
   0x3   :  { %8 = vst [vmem:[%s29_s1 + $0x8] sm:$0xff] %v4_v0 }

// kernel: tile.29
= control target key start
LH: loop header
LB: loop body
LE: loop exit
PB: predicated region body
PF: predicated region fallthrough
CT: control target
= control target key end

     0   :  { %s131_s10 = smov 120   ;;  %s132_s11 = smov 104   ;;  %vm3_vm0 = vcmask 64512   ;;  %vm9_vm1 = vcmask 1048512   ;;  %vm15_vm2 = vcmask 982912   ;;  %vm21_vm3 = vcmask 917312   ;;  %s207_s0 = inlined_call_operand.vmem [shape: f32[16,8], index: 0, kind: input, shape index: {}]   ;;  %s208_s1 = inlined_call_operand.vmem [shape: f32[1,128], index: 1, kind: output, shape index: {}]  }
   0x1   :  { %v101_v0 = vld [vmem:[%s207_s0 + $0xf] sm:$0x1]   ;;  %v103_v1 = vld [vmem:[%s207_s0 + $0xd] sm:$0x1]   ;;  %v105_v2 = vld [vmem:[%s207_s0 + $0xb] sm:$0x1]  }
   0x2   :  { %7 = vrot.lane.b32.xlu0 %v101_v0, %s131_s10  ;;  %19 = vrot.lane.b32.xlu1 %v103_v1, %s132_s11  ;;  %s133_s14 = smov 88   ;;  %v102_v3 = vld [vmem:[%s207_s0 + $0xe] sm:$0x1]   ;;  %v104_v4 = vld [vmem:[%s207_s0 + $0xc] sm:$0x1]   ;;  %s134_s19 = smov 112  }
   0x3   :  { %31 = vrot.lane.b32.xlu2 %v105_v2, %s133_s14  ;;  %s135_s20 = smov 96   ;;  %v106_v5 = vld [vmem:[%s207_s0 + $0xa] sm:$0x1]   ;;  %s136_s23 = smov 80   ;;  %v107_v6 = vld [vmem:[%s207_s0 + $0x9] sm:$0x1]  }
   0x4   :  { %v108_v7 = vld [vmem:[%s207_s0 + $0x8] sm:$0x1]   ;;  %s137_s28 = smov 72   ;;  %s138_s29 = smov 64   ;;  %v109_v8 = vld [vmem:[%s207_s0 + $0x7] sm:$0x1]  }
   0x5   :  { %s139_s3 = smov 56   ;;  %v110_v9 = vld [vmem:[%s207_s0 + $0x6] sm:$0x1]   ;;  %v111_v10 = vld [vmem:[%s207_s0 + $0x5] sm:$0x1]   ;;  %s140_s8 = smov 48  }
   0x6   :  { %s141_s9 = smov 40   ;;  %v112_v11 = vld [vmem:[%s207_s0 + $0x4] sm:$0x1]   ;;  %s142_s12 = smov 32   ;;  %v113_v12 = vld [vmem:[%s207_s0 + $0x3] sm:$0x1]  }
   0x7   :  { %v114_v13 = vld [vmem:[%s207_s0 + $0x2] sm:$0x1]   ;;  %s143_s17 = smov 24   ;;  %s144_s18 = smov 16   ;;  %v115_v14 = vld [vmem:[%s207_s0 + $0x1] sm:$0x1]  }
   0x8   :  { %s145_s21 = smov 8   ;;  %v2_v15 = vld [vmem:[%s207_s0] sm:$0x1]   ;;  %vm27_vm4 = vcmask 851712   ;;  %vm33_vm5 = vcmask 786112   ;;  %vm39_vm6 = vcmask 720512  }
   0x9   :  { %4 = vst.msk [vmem:[#allocation0] sm:$0x1] %vm3_vm0, %v2_v15   ;;  %vm45_vm7 = vcmask 654912   ;;  %vm51_vm8 = vcmask 589312   ;;  %vm57_vm9 = vcmask 523712   ;;  %vm63_vm10 = vcmask 458112  }
   0xa   :  { %13 = vrot.lane.b32.xlu0 %v102_v3, %s134_s19  ;;  %25 = vrot.lane.b32.xlu1 %v104_v4, %s135_s20  ;;  %vm69_vm11 = vcmask 392512   ;;  %vm75_vm12 = vcmask 326912   ;;  %vm81_vm13 = vcmask 261312   ;;  %vm87_vm14 = vcmask 195712  }
   0xb   :  { %37 = vrot.lane.b32.xlu2 %v106_v5, %s136_s23  ;;  %vm93_vm15 = vcmask 130112  }
  0x12   :  { %43 = vrot.lane.b32.xlu0 %v107_v6, %s137_s28  ;;  %49 = vrot.lane.b32.xlu1 %v108_v7, %s138_s29 }
  0x13   :  { %55 = vrot.lane.b32.xlu2 %v109_v8, %s139_s3 }
  0x1a   :  { %61 = vrot.lane.b32.xlu0 %v110_v9, %s140_s8  ;;  %67 = vrot.lane.b32.xlu1 %v111_v10, %s141_s9 }
  0x1b   :  { %73 = vrot.lane.b32.xlu2 %v112_v11, %s142_s12 }
  0x22   :  { %79 = vrot.lane.b32.xlu0 %v113_v12, %s143_s17  ;;  %85 = vrot.lane.b32.xlu1 %v114_v13, %s144_s18 }
  0x23   :  { %91 = vrot.lane.b32.xlu2 %v115_v14, %s145_s21 }
  0x5d   :  { %v32_v16 = vpop.permute.xlu2 %31  }
  0x65   :  { %v38_v17 = vpop.permute.xlu2 %37  }
  0x6d   :  { %v56_v18 = vpop.permute.xlu2 %55  }
  0x74   :  { %v8_v19 = vpop.permute.xlu0 %7   ;;  %v20_v20 = vpop.permute.xlu1 %19  }
  0x75   :  { %10 = vst.msk [vmem:[#allocation0] sm:$0x1] %vm9_vm1, %v8_v19   ;;  %v74_v21 = vpop.permute.xlu2 %73  }
  0x7c   :  { %v14_v22 = vpop.permute.xlu0 %13   ;;  %v26_v23 = vpop.permute.xlu1 %25  }
  0x7d   :  { %16 = vst.msk [vmem:[#allocation0] sm:$0x1] %vm15_vm2, %v14_v22   ;;  %v92_v24 = vpop.permute.xlu2 %91  }
  0x7e   :  { %22 = vst.msk [vmem:[#allocation0] sm:$0x1] %vm21_vm3, %v20_v20  }
  0x7f   :  { %28 = vst.msk [vmem:[#allocation0] sm:$0x1] %vm27_vm4, %v26_v23  }
  0x80   :  { %34 = vst.msk [vmem:[#allocation0] sm:$0x1] %vm33_vm5, %v32_v16  }
  0x81   :  { %40 = vst.msk [vmem:[#allocation0] sm:$0x1] %vm39_vm6, %v38_v17  }
  0x84   :  { %v44_v25 = vpop.permute.xlu0 %43   ;;  %v50_v26 = vpop.permute.xlu1 %49  }
  0x85   :  { %46 = vst.msk [vmem:[#allocation0] sm:$0x1] %vm45_vm7, %v44_v25  }
  0x86   :  { %52 = vst.msk [vmem:[#allocation0] sm:$0x1] %vm51_vm8, %v50_v26  }
  0x87   :  { %58 = vst.msk [vmem:[#allocation0] sm:$0x1] %vm57_vm9, %v56_v18  }
  0x8c   :  { %v62_v27 = vpop.permute.xlu0 %61   ;;  %v68_v28 = vpop.permute.xlu1 %67  }
  0x8d   :  { %64 = vst.msk [vmem:[#allocation0] sm:$0x1] %vm63_vm10, %v62_v27  }
  0x8e   :  { %70 = vst.msk [vmem:[#allocation0] sm:$0x1] %vm69_vm11, %v68_v28  }
  0x8f   :  { %76 = vst.msk [vmem:[#allocation0] sm:$0x1] %vm75_vm12, %v74_v21  }
  0x94   :  { %v80_v29 = vpop.permute.xlu0 %79   ;;  %v86_v30 = vpop.permute.xlu1 %85  }
  0x95   :  { %82 = vst.msk [vmem:[#allocation0] sm:$0x1] %vm81_vm13, %v80_v29  }
  0x96   :  { %88 = vst.msk [vmem:[#allocation0] sm:$0x1] %vm87_vm14, %v86_v30  }
  0x97   :  { %94 = vst.msk [vmem:[#allocation0] sm:$0x1] %vm93_vm15, %v92_v24  }
  0x9e   :  { %v97_v31 = vld [vmem:[#allocation0] sm:$0x1] }
  0x9f   :  { %100 = vst [vmem:[%s208_s1] sm:$0x1] %v97_v31 }

// kernel: conv2_forward.4
= control target key start
LH: loop header
LB: loop body
LE: loop exit
PB: predicated region body
PF: predicated region fallthrough
CT: control target
= control target key end

     0   :  { %v621_v3 = vmov 0.0   ;;  %vm296_vm0 = vcmask 1046528   ;;  %vm107_vm1 = vsmask.f32 7424  ;;  %vm408_vm2 = vcmask 1045504   ;;  %s765_s1 = inlined_call_operand.vmem [shape: bf16[3,128,128], index: 1, kind: input, shape index: {}]   ;;  %s766_s0 = inlined_call_operand.vmem [shape: f32[2,16,128], index: 0, kind: input, shape index: {}]   ;;  %s767_s2 = inlined_call_operand.vmem [shape: f32[1,128], index: 2, kind: input, shape index: {}]   ;;  %s768_s3 = inlined_call_operand.vmem [shape: f32[1,128], index: 3, kind: input, shape index: {}]   ;;  %s769_s4 = inlined_call_operand.vmem [shape: f32[2,16,128], index: 4, kind: output, shape index: {0}]   ;;  %s770_s5 = inlined_call_operand.vmem [shape: f32[1,2,128], index: 5, kind: output, shape index: {1}]  }
   0x1   :  { %v601_v0 = vld [vmem:[%s765_s1 + $0x78] sm:$0xff]  ;;  %43 = vst [vmem:[#allocation2] sm:$0x1] %v621_v3  ;;  %v600_v4 = vld [vmem:[%s765_s1 + $0x70] sm:$0xff]  ;;  %v599_v7 = vld [vmem:[%s765_s1 + $0x68] sm:$0xff] }
   0x2   :  { %v593_v1 = vld [vmem:[%s765_s1 + $0x38] sm:$0xff]  ;;  %44 = vst [vmem:[#allocation2 + $0x11] sm:$0x1] %v621_v3  ;;  %182 = vmatpush.bf16.msra.mxu0 %v601_v0  ;;  %v592_v5 = vld [vmem:[%s765_s1 + $0x30] sm:$0xff]  ;;  %610 = vmatpush.bf16.msra.mxu3 %v601_v0  ;;  %v591_v8 = vld [vmem:[%s765_s1 + $0x28] sm:$0xff] }
   0x3   :  { %v609_v2 = vld [vmem:[%s765_s1 + $0xb8] sm:$0xff]  ;;  %256 = vmatpush.bf16.msra.mxu1 %v593_v1  ;;  %47 = vst [vmem:[#allocation2 + $0x12] sm:$0x1] %v621_v3  ;;  %v608_v6 = vld [vmem:[%s765_s1 + $0xb0] sm:$0xff]  ;;  %v607_v9 = vld [vmem:[%s765_s1 + $0xa8] sm:$0xff] }
   0x4   :  { %353 = vmatpush.bf16.msra.mxu2 %v609_v2  ;;  %48 = vst [vmem:[#allocation2 + $0x23] sm:$0x1] %v621_v3  ;;  %v598_v10 = vld [vmem:[%s765_s1 + $0x60] sm:$0xff]  ;;  %v20_v12 = vld [vmem:[%s766_s0 + $0x8] sm:$0xff]  ;;  %v21_v13 = vld [vmem:[%s766_s0 + $0x10] sm:$0xff] }
   0x5   :  { %v19_v11 = vld [vmem:[%s766_s0] sm:$0xff]  ;;  %v22_v14 = vld [vmem:[%s766_s0 + $0x18] sm:$0xff]  ;;  %v596_v34 = vld [vmem:[%s765_s1 + $0x50] sm:$0xff] }
   0x6   :  { %183 = vmatpush.bf16.msra.mxu0 %v600_v4  ;;  %611 = vmatpush.bf16.msra.mxu3 %v600_v4  ;;  %v619_v15 = vld [vmem:[%s767_s2] ss:$0 sm:$0xff]  ;;  %v597_v26 = vld [vmem:[%s765_s1 + $0x58] sm:$0xff]  ;;  %v588_v35 = vld [vmem:[%s765_s1 + $0x10] sm:$0xff] }
   0x7   :  { %257 = vmatpush.bf16.msra.mxu1 %v592_v5  ;;  %v590_v16 = vld [vmem:[%s765_s1 + $0x20] sm:$0xff]  ;;  %v27_v19 = vmul.f32 %v619_v15, %v19_v11  ;;  %v28_v20 = vmul.f32 %v619_v15, %v20_v12  ;;  %v29_v21 = vmul.f32 %v619_v15, %v21_v13  ;;  %v30_v22 = vmul.f32 %v619_v15, %v22_v14  ;;  %v589_v27 = vld [vmem:[%s765_s1 + $0x18] sm:$0xff]  ;;  %v604_v36 = vld [vmem:[%s765_s1 + $0x90] sm:$0xff] }
   0x8   :  { %354 = vmatpush.bf16.msra.mxu2 %v608_v6  ;;  %v620_v17 = vld [vmem:[%s768_s3] ss:$0 sm:$0xff]  ;;  %v605_v29 = vld [vmem:[%s765_s1 + $0x98] sm:$0xff]  ;;  %v595_v37 = vld [vmem:[%s765_s1 + $0x48] sm:$0xff] }
   0x9   :  { %v606_v18 = vld [vmem:[%s765_s1 + $0xa0] sm:$0xff]  ;;  %v35_v23 = vadd.f32 %v620_v17, %v27_v19  ;;  %v36_v24 = vadd.f32 %v620_v17, %v28_v20  ;;  %v37_v25 = vadd.f32 %v620_v17, %v29_v21  ;;  %v38_v28 = vadd.f32 %v620_v17, %v30_v22  ;;  %v587_v38 = vld [vmem:[%s765_s1 + $0x8] sm:$0xff] }
   0xa   :  { %184 = vmatpush.bf16.msra.mxu0 %v599_v7  ;;  %612 = vmatpush.bf16.msra.mxu3 %v599_v7  ;;  %v603_v39 = vld [vmem:[%s765_s1 + $0x88] sm:$0xff]  ;;  %v594_v43 = vld [vmem:[%s765_s1 + $0x40] sm:$0xff] }
   0xb   :  { %258 = vmatpush.bf16.msra.mxu1 %v591_v8  ;;  %v39_v30 = vmax.f32 %v35_v23, 0.0  ;;  %v40_v31 = vmax.f32 %v36_v24, 0.0  ;;  %v41_v32 = vmax.f32 %v37_v25, 0.0  ;;  %v42_v33 = vmax.f32 %v38_v28, 0.0  ;;  %v586_v44 = vld [vmem:[%s765_s1] sm:$0xff] }
   0xc   :  { %355 = vmatpush.bf16.msra.mxu2 %v607_v9  ;;  %v602_v47 = vld [vmem:[%s765_s1 + $0x80] sm:$0xff] }
   0xd   :  { %45 = vst [vmem:[#allocation2 + $0x1] sm:$0xff] %v39_v30 }
   0xe   :  { %185 = vmatpush.bf16.msra.mxu0 %v598_v10  ;;  %613 = vmatpush.bf16.msra.mxu3 %v598_v10  ;;  %46 = vst [vmem:[#allocation2 + $0x9] sm:$0xff] %v40_v31 }
   0xf   :  { %259 = vmatpush.bf16.msra.mxu1 %v590_v16  ;;  %49 = vst [vmem:[#allocation2 + $0x13] sm:$0xff] %v41_v32 }
  0x10   :  { %356 = vmatpush.bf16.msra.mxu2 %v606_v18  ;;  %50 = vst [vmem:[#allocation2 + $0x1b] sm:$0xff] %v42_v33 }
  0x12   :  { %186 = vmatpush.bf16.msra.mxu0 %v597_v26  ;;  %614 = vmatpush.bf16.msra.mxu3 %v597_v26 }
  0x13   :  { %260 = vmatpush.bf16.msra.mxu1 %v589_v27 }
  0x14   :  { %357 = vmatpush.bf16.msra.mxu2 %v605_v29  ;;  %v51_v40 = vld [vmem:[#allocation2] sm:$0xff] }
  0x15   :  { %v52_v41 = vld [vmem:[#allocation2 + $0x8] sm:$0xff]  ;;  %v56_v42 = vpack.c.bf16 %v51_v40, %v51_v40 }
  0x16   :  { %187 = vmatpush.bf16.msra.mxu0 %v596_v34  ;;  %615 = vmatpush.bf16.msra.mxu3 %v596_v34  ;;  %v53_v45 = vld [vmem:[#allocation2 + $0x10] sm:$0xff]  ;;  %v57_v46 = vpack.c.bf16 %v52_v41, %v52_v41 }
  0x17   :  { %261 = vmatpush.bf16.msra.mxu1 %v588_v35  ;;  %v54_v48 = vld [vmem:[#allocation2 + $0x18] sm:$0xff]  ;;  %v58_v49 = vpack.c.bf16 %v53_v45, %v53_v45  ;;  %v99_v50 = vunpack.c.l.b16 %v56_v42  ;;  %v55_v51 = vld [vmem:[#allocation2 + $0x20] sm:$0xf] }
  0x18   :  { %358 = vmatpush.bf16.msra.mxu2 %v604_v36  ;;  %v59_v52 = vpack.c.bf16 %v54_v48, %v54_v48  ;;  %v100_v53 = vunpack.c.l.b16 %v57_v46  ;;  %v60_v54 = vpack.c.bf16 %v55_v51, %v55_v51 }
  0x19   :  { %v101_v55 = vunpack.c.l.b16 %v58_v49 }
  0x1a   :  { %188 = vmatpush.bf16.msra.mxu0 %v595_v37  ;;  %616 = vmatpush.bf16.msra.mxu3 %v595_v37  ;;  %v102_v56 = vunpack.c.l.b16 %v59_v52  ;;  %v104_v57 = vpack.c.b16 %v100_v53, %v99_v50  ;;  %v103_v58 = vunpack.c.l.b16 %v60_v54 }
  0x1b   :  { %262 = vmatpush.bf16.msra.mxu1 %v587_v38 }
  0x1c   :  { %359 = vmatpush.bf16.msra.mxu2 %v603_v39  ;;  %v105_v59 = vpack.c.b16 %v102_v56, %v101_v55  ;;  %v109_v60 = vshrl.u32 %v104_v57, 16  ;;  %v111_v61 = vshll.u32 %v104_v57, 16  ;;  %v297_v62 = vrot.slane %v104_v57, 1 }
  0x1d   :  { %v106_v63 = vpack.c.b16 %v103_v58, %v103_v58 }
  0x1e   :  { %189 = vmatpush.bf16.msra.mxu0 %v594_v43  ;;  %617 = vmatpush.bf16.msra.mxu3 %v594_v43  ;;  %v113_v0 = vrot.slane %v111_v61, 1  ;;  %v116_v1 = vshll.u32 %v105_v59, 16  ;;  %v298_v2 = vrot.slane %v105_v59, 1  ;;  %v120_v3 = vshrl.u32 %v105_v59, 16 }
  0x1f   :  { %263 = vmatpush.bf16.msra.mxu1 %v586_v44  ;;  %v124_v4 = vshll.u32 %v106_v63, 16  ;;  %v300_v12 = vrot.slane %v106_v63, 1  ;;  %v128_v13 = vshrl.u32 %v106_v63, 16 }
  0x20   :  { %360 = vmatpush.bf16.msra.mxu2 %v602_v47  ;;  %v114_v5 = vor.u32 %v113_v0, %v109_v60  ;;  %v118_v6 = vrot.slane %v116_v1, 1  ;;  %v299_v7 = vsel %vm296_vm0, %v297_v62, %v298_v2 }
  0x21   :  { %v126_v8 = vrot.slane %v124_v4, 1  ;;  %v301_v14 = vsel %vm296_vm0, %v298_v2, %v300_v12 }
  0x22   :  { %264 = vmatmul.bf16.vlgmr.msra.gmra.mxu1 %v104_v57  ;;  %v119_v9 = vsel %vm107_vm1, %v114_v5, %v118_v6  ;;  %v122_v10 = vor.u32 %v120_v3, %v118_v6 }
  0x23   :  { %361 = vmatmul.bf16.vlgmr.msra.gmra.mxu2 %v299_v7  ;;  %190 = vmatmul.bf16.vlgmr.msra.gmra.mxu0 %v119_v9  ;;  %v130_v15 = vor.u32 %v128_v13, %v126_v8 }
  0x24   :  { %v127_v11 = vsel %vm107_vm1, %v122_v10, %v126_v8 }
  0x25   :  { %195 = vmatmul.bf16.vlgmr.msra.gmra.mxu3 %v127_v11 }
  0x32   :  { %269 = vmatmul.bf16.gmra.mxu1 %v105_v59 }
  0x33   :  { %366 = vmatmul.bf16.gmra.mxu2 %v301_v14 }
  0x35   :  { %200 = vmatmul.bf16.gmra.mxu3 %v130_v15 }
  0x42   :  { %274 = vmatmul.bf16.gmra.mxu1 %v106_v63 }
  0x43   :  { %371 = vmatmul.bf16.gmra.mxu2 %v300_v12 }
  0x9f   :  { %v265_v16 = vpop.f32.mrf.mxu1 }
  0xa0   :  { %v191_v17 = vpop.f32.mrf.mxu0 }
  0xa1   :  { %v266_v18 = vadd.f32 %v265_v16, %v191_v17 }
  0xa6   :  { %v362_v20 = vpop.f32.mrf.mxu2 }
  0xa7   :  { %v267_v19 = vpop.f32.mrf.mxu1  ;;  %v376_v21 = vadd.f32 %v362_v20, %v266_v18 }
  0xa8   :  { %v193_v22 = vpop.f32.mrf.mxu0  ;;  %v196_v23 = vpop.f32.mrf.mxu3 }
  0xa9   :  { %381 = vst [vmem:[%s769_s4] sm:$0xff] %v376_v21  ;;  %v268_v25 = vadd.f32 %v267_v19, %v193_v22  ;;  %v391_v39 = vmul.f32 %v376_v21, %v376_v21 }
  0xae   :  { %v364_v26 = vpop.f32.mrf.mxu2 }
  0xaf   :  { %v270_v24 = vpop.f32.mrf.mxu1  ;;  %v377_v27 = vadd.f32 %v364_v26, %v268_v25 }
  0xb0   :  { %v198_v28 = vpop.f32.mrf.mxu3  ;;  %v271_v29 = vadd.f32 %v270_v24, %v196_v23 }
  0xb1   :  { %382 = vst [vmem:[%s769_s4 + $0x8] sm:$0xff] %v377_v27  ;;  %v392_v36 = vmul.f32 %v377_v27, %v377_v27  ;;  %v383_v40 = vadd.f32 %v377_v27, %v376_v21 }
  0xb3   :  { %v393_v41 = vadd.f32 %v392_v36, %v391_v39  ;;  %v384_v44 = vrot.slane %v383_v40, 4 }
  0xb5   :  { %v394_v47 = vrot.slane %v393_v41, 4  ;;  %v385_v52 = vadd.f32 %v384_v44, %v383_v40 }
  0xb6   :  { %v367_v31 = vpop.f32.mrf.mxu2 }
  0xb7   :  { %v272_v30 = vpop.f32.mrf.mxu1  ;;  %v378_v32 = vadd.f32 %v367_v31, %v271_v29  ;;  %v395_v57 = vadd.f32 %v394_v47, %v393_v41  ;;  %v386_v62 = vrot.slane %v385_v52, 2 }
  0xb8   :  { %v201_v33 = vpop.f32.mrf.mxu3  ;;  %v273_v35 = vadd.f32 %v272_v30, %v198_v28 }
  0xb9   :  { %583 = vst [vmem:[%s769_s4 + $0xe] sm:$0xfc] %v378_v32  ;;  %v424_v49 = vmul.f32 %v378_v32, %v378_v32  ;;  %v409_v53 = vrot.slane %v378_v32, 2  ;;  %v396_v2 = vrot.slane %v395_v57, 2  ;;  %v387_v6 = vadd.f32 %v386_v62, %v385_v52 }
  0xbb   :  { %v430_v58 = vrot.slane %v424_v49, 2  ;;  %v397_v9 = vadd.f32 %v396_v2, %v395_v57  ;;  %v388_v12 = vrot.slane %v387_v6, 1 }
  0xbd   :  { %v398_v15 = vrot.slane %v397_v9, 1  ;;  %v389_v18 = vadd.f32 %v388_v12, %v387_v6 }
  0xbe   :  { %v369_v37 = vpop.f32.mrf.mxu2 }
  0xbf   :  { %v275_v34 = vpop.f32.mrf.mxu1  ;;  %v379_v38 = vadd.f32 %v369_v37, %v273_v35  ;;  %v399_v21 = vadd.f32 %v398_v15, %v397_v9 }
  0xc0   :  { %v203_v42 = vpop.f32.mrf.mxu3  ;;  %v276_v43 = vadd.f32 %v275_v34, %v201_v33 }
  0xc1   :  { %584 = vst [vmem:[%s769_s4 + $0x16] sm:$0xff] %v379_v38  ;;  %v425_v46 = vmul.f32 %v379_v38, %v379_v38  ;;  %v410_v50 = vrot.slane %v379_v38, 2 }
  0xc3   :  { %v431_v54 = vrot.slane %v425_v46, 2  ;;  %v411_v59 = vsel %vm408_vm2, %v409_v53, %v410_v50 }
  0xc5   :  { %v432_v0 = vsel %vm408_vm2, %v430_v58, %v431_v54 }
  0xc6   :  { %v372_v48 = vpop.f32.mrf.mxu2 }
  0xc7   :  { %v277_v45 = vpop.f32.mrf.mxu1  ;;  %v380_v51 = vadd.f32 %v372_v48, %v276_v43 }
  0xc9   :  { %585 = vst [vmem:[%s769_s4 + $0x1e] sm:$0x3] %v380_v51  ;;  %v412_v55 = vrot.slane %v380_v51, 2  ;;  %v426_v56 = vmul.f32 %v380_v51, %v380_v51 }
  0xcb   :  { %v413_v60 = vsel %vm408_vm2, %v410_v50, %v412_v55  ;;  %v433_v61 = vrot.slane %v426_v56, 2 }
  0xcc   :  { %v416_v63 = vadd.f32 %v413_v60, %v411_v59 }
  0xcd   :  { %v434_v1 = vsel %vm408_vm2, %v431_v54, %v433_v61 }
  0xce   :  { %v417_v3 = vrot.slane %v416_v63, 4  ;;  %v437_v4 = vadd.f32 %v434_v1, %v432_v0  ;;  %v374_v5 = vpop.f32.mrf.mxu2 }
  0xd0   :  { %v418_v7 = vadd.f32 %v417_v3, %v416_v63  ;;  %v438_v8 = vrot.slane %v437_v4, 4 }
  0xd2   :  { %v419_v10 = vrot.slane %v418_v7, 2  ;;  %v439_v11 = vadd.f32 %v438_v8, %v437_v4 }
  0xd4   :  { %v420_v13 = vadd.f32 %v419_v10, %v418_v7  ;;  %v440_v14 = vrot.slane %v439_v11, 2 }
  0xd6   :  { %v421_v16 = vrot.slane %v420_v13, 1  ;;  %v441_v17 = vadd.f32 %v440_v14, %v439_v11 }
  0xd8   :  { %v422_v19 = vadd.f32 %v421_v16, %v420_v13  ;;  %v442_v20 = vrot.slane %v441_v17, 1 }
  0xda   :  { %v423_v22 = vadd.f32 %v422_v19, %v389_v18  ;;  %v443_v23 = vadd.f32 %v442_v20, %v441_v17 }
  0xdc   :  { %v444_v24 = vadd.f32 %v443_v23, %v399_v21  ;;  %445 = vst [vmem:[%s770_s5] sm:$0x1] %v423_v22 }
  0xde   :  { %446 = vst [vmem:[%s770_s5 + $0x1] sm:$0x1] %v444_v24 }

// kernel: conv2_forward.5
= control target key start
LH: loop header
LB: loop body
LE: loop exit
PB: predicated region body
PF: predicated region fallthrough
CT: control target
= control target key end

     0   :  { %s98_s0 = inlined_call_operand.vmem [shape: f32[32,128], index: 0, kind: input, shape index: {}, may-alias: {0,3}]   ;;  %s99_s1 = inlined_call_operand.vmem [shape: f32[1,128], index: 1, kind: input, shape index: {}]   ;;  %s100_s2 = inlined_call_operand.vmem [shape: f32[1,128], index: 2, kind: input, shape index: {}]   ;;  %s101_s3 = inlined_call_operand.vmem [shape: f32[32,128], index: 3, kind: output, shape index: {}, may-alias: {0,3}]  }
   0x1   :  { %v14_v0 = vld [vmem:[%s98_s0] sm:$0xff]  ;;  %v15_v3 = vld [vmem:[%s98_s0 + $0x8] sm:$0xff]  ;;  %v16_v6 = vld [vmem:[%s98_s0 + $0x10] sm:$0xff] }
   0x2   :  { %v46_v1 = vld [vmem:[%s99_s1] ss:$0 sm:$0xff]  ;;  %v17_v7 = vld [vmem:[%s98_s0 + $0x18] sm:$0xff] }
   0x3   :  { %v47_v2 = vld [vmem:[%s100_s2] ss:$0 sm:$0xff]  ;;  %v22_v4 = vmul.f32 %v46_v1, %v14_v0  ;;  %v23_v5 = vmul.f32 %v46_v1, %v15_v3  ;;  %v24_v8 = vmul.f32 %v46_v1, %v16_v6  ;;  %v25_v9 = vmul.f32 %v46_v1, %v17_v7 }
   0x5   :  { %v30_v10 = vadd.f32 %v47_v2, %v22_v4  ;;  %v31_v11 = vadd.f32 %v47_v2, %v23_v5  ;;  %v32_v12 = vadd.f32 %v47_v2, %v24_v8  ;;  %v33_v13 = vadd.f32 %v47_v2, %v25_v9 }
   0x7   :  { %v34_v14 = vmax.f32 %v30_v10, 0.0  ;;  %v35_v15 = vmax.f32 %v31_v11, 0.0  ;;  %v36_v16 = vmax.f32 %v32_v12, 0.0  ;;  %v37_v17 = vmax.f32 %v33_v13, 0.0 }
   0x9   :  { %38 = vst [vmem:[%s101_s3] sm:$0xff] %v34_v14 }
   0xa   :  { %39 = vst [vmem:[%s101_s3 + $0x8] sm:$0xff] %v35_v15 }
   0xb   :  { %40 = vst [vmem:[%s101_s3 + $0x10] sm:$0xff] %v36_v16 }
   0xc   :  { %41 = vst [vmem:[%s101_s3 + $0x18] sm:$0xff] %v37_v17 }

// kernel: conv2_forward.3
= control target key start
LH: loop header
LB: loop body
LE: loop exit
PB: predicated region body
PF: predicated region fallthrough
CT: control target
= control target key end

     0   :  { %vm24_vm0 = vcmask 516096   ;;  %v450_v3 = vmov 0.0   ;;  %vm27_vm1 = vcmask 523264   ;;  %vm216_vm2 = vcmask 1046528   ;;  %s569_s1 = inlined_call_operand.vmem [shape: bf16[3,64,128], index: 1, kind: input, shape index: {}]   ;;  %s570_s2 = inlined_call_operand.vmem [shape: f32[1,64], index: 2, kind: input, shape index: {}, may-alias: {2,3}]   ;;  %s571_s3 = inlined_call_operand.vmem [shape: f32[1,64], index: 3, kind: input, shape index: {}, may-alias: {2,3}]   ;;  %s572_s0 = inlined_call_operand.vmem [shape: f32[2,16,64], index: 0, kind: input, shape index: {}]   ;;  %s573_s4 = inlined_call_operand.vmem [shape: f32[2,16,128], index: 4, kind: output, shape index: {0}]   ;;  %s574_s5 = inlined_call_operand.vmem [shape: f32[1,2,128], index: 5, kind: output, shape index: {1}]  }
   0x1   :  { %v436_v0 = vld [vmem:[%s569_s1 + $0x18] sm:$0xff]  ;;  %25 = vst.msk [vmem:[#allocation2] sm:$0x1] %vm24_vm0, %v450_v3  ;;  %v435_v4 = vld [vmem:[%s569_s1 + $0x10] sm:$0xff]  ;;  %v20_v7 = vld [vmem:[%s572_s0] sm:$0xff]  ;;  %vm310_vm4 = vcmask 1045504  }
   0x2   :  { %v444_v1 = vld [vmem:[%s569_s1 + $0x58] sm:$0xff]  ;;  %26 = vst.msk [vmem:[#allocation2 + $0x11] sm:$0x1] %vm24_vm0, %v450_v3  ;;  %188 = vmatpush.bf16.msra.mxu1 %v436_v0  ;;  %v443_v5 = vld [vmem:[%s569_s1 + $0x50] sm:$0xff]  ;;  %v21_v8 = vld [vmem:[%s572_s0 + $0x8] sm:$0xff] }
   0x3   :  { %v440_v2 = vld [vmem:[%s569_s1 + $0x38] sm:$0xff]  ;;  %259 = vmatpush.bf16.msra.mxu2 %v444_v1  ;;  %30 = vst.msk [vmem:[#allocation2 + $0x12] sm:$0x1] %vm24_vm0, %v450_v3  ;;  %v439_v6 = vld [vmem:[%s569_s1 + $0x30] sm:$0xff]  ;;  %v434_v11 = vld [vmem:[%s569_s1 + $0x8] sm:$0xff] }
   0x4   :  { %135 = vmatpush.bf16.msra.mxu0 %v440_v2  ;;  %445 = vmatpush.bf16.msra.mxu3 %v440_v2  ;;  %31 = vst.msk [vmem:[#allocation2 + $0x23] sm:$0x1] %vm24_vm0, %v450_v3  ;;  %v22_v9 = vld [vmem:[%s572_s0 + $0x10] sm:$0xff]  ;;  %v23_v10 = vld [vmem:[%s572_s0 + $0x18] sm:$0xff]  ;;  %v442_v12 = vld [vmem:[%s569_s1 + $0x48] sm:$0xff] }
   0x5   :  { %28 = vst.msk [vmem:[#allocation2 + $0x1] sm:$0xff] %vm27_vm1, %v20_v7  ;;  %v438_v13 = vld [vmem:[%s569_s1 + $0x28] sm:$0xff]  ;;  %v433_v14 = vld [vmem:[%s569_s1] sm:$0xff]  ;;  %vm74_vm3 = vsmask.f32 7424 }
   0x6   :  { %29 = vst.msk [vmem:[#allocation2 + $0x9] sm:$0xff] %vm27_vm1, %v21_v8  ;;  %189 = vmatpush.bf16.msra.mxu1 %v435_v4  ;;  %v441_v15 = vld [vmem:[%s569_s1 + $0x40] sm:$0xff] }
   0x7   :  { %260 = vmatpush.bf16.msra.mxu2 %v443_v5  ;;  %32 = vst.msk [vmem:[#allocation2 + $0x13] sm:$0xff] %vm27_vm1, %v22_v9  ;;  %v437_v17 = vld [vmem:[%s569_s1 + $0x20] sm:$0xff] }
   0x8   :  { %136 = vmatpush.bf16.msra.mxu0 %v439_v6  ;;  %446 = vmatpush.bf16.msra.mxu3 %v439_v6  ;;  %33 = vst.msk [vmem:[#allocation2 + $0x1b] sm:$0xff] %vm27_vm1, %v23_v10 }
   0xa   :  { %190 = vmatpush.bf16.msra.mxu1 %v434_v11 }
   0xb   :  { %261 = vmatpush.bf16.msra.mxu2 %v442_v12 }
   0xc   :  { %137 = vmatpush.bf16.msra.mxu0 %v438_v13  ;;  %447 = vmatpush.bf16.msra.mxu3 %v438_v13  ;;  %v34_v16 = vld [vmem:[#allocation2] sm:$0xff] }
   0xd   :  { %v35_v18 = vld [vmem:[#allocation2 + $0x8] sm:$0xff]  ;;  %v39_v19 = vpack.c.bf16 %v34_v16, %v34_v16 }
   0xe   :  { %v40_v20 = vpack.c.bf16 %v35_v18, %v35_v18  ;;  %v36_v21 = vld [vmem:[#allocation2 + $0x10] sm:$0xff]  ;;  %191 = vmatpush.bf16.msra.mxu1 %v433_v14 }
   0xf   :  { %262 = vmatpush.bf16.msra.mxu2 %v441_v15  ;;  %v66_v22 = vunpack.c.l.b16 %v39_v19  ;;  %v37_v23 = vld [vmem:[#allocation2 + $0x18] sm:$0xff]  ;;  %v41_v24 = vpack.c.bf16 %v36_v21, %v36_v21  ;;  %v38_v25 = vld [vmem:[#allocation2 + $0x20] sm:$0xf] }
  0x10   :  { %v67_v26 = vunpack.c.l.b16 %v40_v20  ;;  %v42_v27 = vpack.c.bf16 %v37_v23, %v37_v23  ;;  %138 = vmatpush.bf16.msra.mxu0 %v437_v17  ;;  %448 = vmatpush.bf16.msra.mxu3 %v437_v17  ;;  %v43_v28 = vpack.c.bf16 %v38_v25, %v38_v25 }
  0x11   :  { %v68_v29 = vunpack.c.l.b16 %v41_v24 }
  0x12   :  { %v71_v30 = vpack.c.b16 %v67_v26, %v66_v22  ;;  %v69_v31 = vunpack.c.l.b16 %v42_v27  ;;  %v70_v32 = vunpack.c.l.b16 %v43_v28 }
  0x14   :  { %400 = vmatmul.msk.bf16.vlgmr.msra.gmra.mxu1 %vm27_vm1, %v71_v30  ;;  %v72_v33 = vpack.c.b16 %v69_v31, %v68_v29  ;;  %v217_v34 = vrot.slane %v71_v30, 1  ;;  %v76_v35 = vshrl.u32 %v71_v30, 16  ;;  %v78_v36 = vshll.u32 %v71_v30, 16 }
  0x15   :  { %v73_v37 = vpack.c.b16 %v70_v32, %v70_v32 }
  0x16   :  { %v218_v38 = vrot.slane %v72_v33, 1  ;;  %v80_v39 = vrot.slane %v78_v36, 1  ;;  %v83_v40 = vshll.u32 %v72_v33, 16  ;;  %v87_v41 = vshrl.u32 %v72_v33, 16 }
  0x17   :  { %v91_v42 = vshll.u32 %v73_v37, 16  ;;  %v220_v50 = vrot.slane %v73_v37, 1  ;;  %v95_v51 = vshrl.u32 %v73_v37, 16 }
  0x18   :  { %v219_v43 = vsel %vm216_vm2, %v217_v34, %v218_v38  ;;  %v81_v44 = vor.u32 %v80_v39, %v76_v35  ;;  %v85_v45 = vrot.slane %v83_v40, 1 }
  0x19   :  { %427 = vmatmul.msk.bf16.vlgmr.msra.gmra.mxu2 %vm27_vm1, %v219_v43  ;;  %v93_v46 = vrot.slane %v91_v42, 1  ;;  %v221_v52 = vsel %vm216_vm2, %v218_v38, %v220_v50 }
  0x1a   :  { %v86_v47 = vsel %vm74_vm3, %v81_v44, %v85_v45  ;;  %v89_v48 = vor.u32 %v87_v41, %v85_v45 }
  0x1b   :  { %381 = vmatmul.msk.bf16.vlgmr.msra.gmra.mxu0 %vm27_vm1, %v86_v47  ;;  %v97_v53 = vor.u32 %v95_v51, %v93_v46 }
  0x1c   :  { %v94_v49 = vsel %vm74_vm3, %v89_v48, %v93_v46 }
  0x1d   :  { %382 = vmatmul.msk.bf16.vlgmr.msra.gmra.mxu3 %vm27_vm1, %v94_v49 }
  0x24   :  { %401 = vmatmul.msk.bf16.gmra.mxu1 %vm27_vm1, %v72_v33 }
  0x29   :  { %428 = vmatmul.msk.bf16.gmra.mxu2 %vm27_vm1, %v221_v52 }
  0x2d   :  { %383 = vmatmul.msk.bf16.gmra.mxu3 %vm27_vm1, %v97_v53 }
  0x34   :  { %402 = vmatmul.msk.bf16.gmra.mxu1 %vm27_vm1, %v73_v37 }
  0x39   :  { %429 = vmatmul.msk.bf16.gmra.mxu2 %vm27_vm1, %v220_v50 }
  0x91   :  { %v193_v54 = vpop.f32.mrf.mxu1 }
  0x98   :  { %v140_v55 = vpop.f32.mrf.mxu0 }
  0x99   :  { %v194_v56 = vadd.f32 %v193_v54, %v140_v55  ;;  %v195_v57 = vpop.f32.mrf.mxu1 }
  0x9c   :  { %v264_v58 = vpop.f32.mrf.mxu2 }
  0x9d   :  { %v278_v59 = vadd.f32 %v264_v58, %v194_v56 }
  0x9f   :  { %283 = vst [vmem:[%s573_s4] sm:$0xff] %v278_v59  ;;  %v293_v13 = vmul.f32 %v278_v59, %v278_v59 }
  0xa0   :  { %v142_v60 = vpop.f32.mrf.mxu0  ;;  %v145_v61 = vpop.f32.mrf.mxu3 }
  0xa1   :  { %v196_v62 = vadd.f32 %v195_v57, %v142_v60  ;;  %v198_v63 = vpop.f32.mrf.mxu1 }
  0xa2   :  { %v199_v3 = vadd.f32 %v198_v63, %v145_v61 }
  0xa4   :  { %v266_v0 = vpop.f32.mrf.mxu2 }
  0xa5   :  { %v279_v1 = vadd.f32 %v266_v0, %v196_v62 }
  0xa7   :  { %284 = vst [vmem:[%s573_s4 + $0x8] sm:$0xff] %v279_v1  ;;  %v294_v10 = vmul.f32 %v279_v1, %v279_v1  ;;  %v285_v14 = vadd.f32 %v279_v1, %v278_v59 }
  0xa8   :  { %v147_v2 = vpop.f32.mrf.mxu3 }
  0xa9   :  { %v200_v4 = vpop.f32.mrf.mxu1  ;;  %v295_v15 = vadd.f32 %v294_v10, %v293_v13  ;;  %v286_v19 = vrot.slane %v285_v14, 4 }
  0xaa   :  { %v201_v9 = vadd.f32 %v200_v4, %v147_v2 }
  0xab   :  { %v296_v21 = vrot.slane %v295_v15, 4  ;;  %v287_v26 = vadd.f32 %v286_v19, %v285_v14 }
  0xac   :  { %v269_v5 = vpop.f32.mrf.mxu2 }
  0xad   :  { %v280_v6 = vadd.f32 %v269_v5, %v199_v3  ;;  %v297_v31 = vadd.f32 %v296_v21, %v295_v15  ;;  %v288_v36 = vrot.slane %v287_v26, 2 }
  0xaf   :  { %430 = vst [vmem:[%s573_s4 + $0xe] sm:$0xfc] %v280_v6  ;;  %v326_v23 = vmul.f32 %v280_v6, %v280_v6  ;;  %v311_v27 = vrot.slane %v280_v6, 2  ;;  %v298_v40 = vrot.slane %v297_v31, 2  ;;  %v289_v44 = vadd.f32 %v288_v36, %v287_v26 }
  0xb0   :  { %v150_v7 = vpop.f32.mrf.mxu3 }
  0xb1   :  { %v203_v8 = vpop.f32.mrf.mxu1  ;;  %v332_v32 = vrot.slane %v326_v23, 2  ;;  %v299_v47 = vadd.f32 %v298_v40, %v297_v31  ;;  %v290_v50 = vrot.slane %v289_v44, 1 }
  0xb2   :  { %v204_v17 = vadd.f32 %v203_v8, %v150_v7 }
  0xb3   :  { %v300_v53 = vrot.slane %v299_v47, 1  ;;  %v291_v56 = vadd.f32 %v290_v50, %v289_v44 }
  0xb4   :  { %v271_v11 = vpop.f32.mrf.mxu2 }
  0xb5   :  { %v281_v12 = vadd.f32 %v271_v11, %v201_v9  ;;  %v301_v59 = vadd.f32 %v300_v53, %v299_v47 }
  0xb7   :  { %431 = vst [vmem:[%s573_s4 + $0x16] sm:$0xff] %v281_v12  ;;  %v327_v20 = vmul.f32 %v281_v12, %v281_v12  ;;  %v312_v24 = vrot.slane %v281_v12, 2 }
  0xb8   :  { %v152_v16 = vpop.f32.mrf.mxu3 }
  0xb9   :  { %v205_v18 = vpop.f32.mrf.mxu1  ;;  %v333_v28 = vrot.slane %v327_v20, 2  ;;  %v313_v33 = vsel %vm310_vm4, %v311_v27, %v312_v24 }
  0xbb   :  { %v334_v38 = vsel %vm310_vm4, %v332_v32, %v333_v28 }
  0xbc   :  { %v274_v22 = vpop.f32.mrf.mxu2 }
  0xbd   :  { %v282_v25 = vadd.f32 %v274_v22, %v204_v17 }
  0xbf   :  { %432 = vst [vmem:[%s573_s4 + $0x1e] sm:$0x3] %v282_v25  ;;  %v314_v29 = vrot.slane %v282_v25, 2  ;;  %v328_v30 = vmul.f32 %v282_v25, %v282_v25 }
  0xc1   :  { %v315_v34 = vsel %vm310_vm4, %v312_v24, %v314_v29  ;;  %v335_v35 = vrot.slane %v328_v30, 2 }
  0xc2   :  { %v318_v37 = vadd.f32 %v315_v34, %v313_v33 }
  0xc3   :  { %v336_v39 = vsel %vm310_vm4, %v333_v28, %v335_v35 }
  0xc4   :  { %v319_v41 = vrot.slane %v318_v37, 4  ;;  %v339_v42 = vadd.f32 %v336_v39, %v334_v38  ;;  %v276_v43 = vpop.f32.mrf.mxu2 }
  0xc6   :  { %v320_v45 = vadd.f32 %v319_v41, %v318_v37  ;;  %v340_v46 = vrot.slane %v339_v42, 4 }
  0xc8   :  { %v321_v48 = vrot.slane %v320_v45, 2  ;;  %v341_v49 = vadd.f32 %v340_v46, %v339_v42 }
  0xca   :  { %v322_v51 = vadd.f32 %v321_v48, %v320_v45  ;;  %v342_v52 = vrot.slane %v341_v49, 2 }
  0xcc   :  { %v323_v54 = vrot.slane %v322_v51, 1  ;;  %v343_v55 = vadd.f32 %v342_v52, %v341_v49 }
  0xce   :  { %v324_v57 = vadd.f32 %v323_v54, %v322_v51  ;;  %v344_v58 = vrot.slane %v343_v55, 1 }
  0xd0   :  { %v325_v60 = vadd.f32 %v324_v57, %v291_v56  ;;  %v345_v61 = vadd.f32 %v344_v58, %v343_v55 }
  0xd2   :  { %v346_v62 = vadd.f32 %v345_v61, %v301_v59  ;;  %347 = vst [vmem:[%s574_s5] sm:$0x1] %v325_v60 }
  0xd4   :  { %348 = vst [vmem:[%s574_s5 + $0x1] sm:$0x1] %v346_v62 }

// kernel: tile.28
= control target key start
LH: loop header
LB: loop body
LE: loop exit
PB: predicated region body
PF: predicated region fallthrough
CT: control target
= control target key end

     0   :  { %s28_s0 = inlined_call_operand.vmem [shape: f32[8], index: 0, kind: input, shape index: {}]   ;;  %s29_s1 = inlined_call_operand.vmem [shape: f32[16,8], index: 1, kind: output, shape index: {}]  }
   0x1   :  { %v4_v0 = vld [vmem:[%s28_s0] ss:$0 sm:$0xff] }
   0x2   :  { %5 = vst [vmem:[%s29_s1] sm:$0xff] %v4_v0 }
   0x3   :  { %8 = vst [vmem:[%s29_s1 + $0x8] sm:$0xff] %v4_v0 }

// kernel: tile.29
= control target key start
LH: loop header
LB: loop body
LE: loop exit
PB: predicated region body
PF: predicated region fallthrough
CT: control target
= control target key end

     0   :  { %s131_s10 = smov 120   ;;  %s132_s11 = smov 104   ;;  %vm3_vm0 = vcmask 64512   ;;  %vm9_vm1 = vcmask 1048512   ;;  %vm15_vm2 = vcmask 982912   ;;  %vm21_vm3 = vcmask 917312   ;;  %s207_s0 = inlined_call_operand.vmem [shape: f32[16,8], index: 0, kind: input, shape index: {}]   ;;  %s208_s1 = inlined_call_operand.vmem [shape: f32[1,128], index: 1, kind: output, shape index: {}]  }
   0x1   :  { %v101_v0 = vld [vmem:[%s207_s0 + $0xf] sm:$0x1]   ;;  %v103_v1 = vld [vmem:[%s207_s0 + $0xd] sm:$0x1]   ;;  %v105_v2 = vld [vmem:[%s207_s0 + $0xb] sm:$0x1]  }
   0x2   :  { %7 = vrot.lane.b32.xlu0 %v101_v0, %s131_s10  ;;  %19 = vrot.lane.b32.xlu1 %v103_v1, %s132_s11  ;;  %s133_s14 = smov 88   ;;  %v102_v3 = vld [vmem:[%s207_s0 + $0xe] sm:$0x1]   ;;  %v104_v4 = vld [vmem:[%s207_s0 + $0xc] sm:$0x1]   ;;  %s134_s19 = smov 112  }
   0x3   :  { %31 = vrot.lane.b32.xlu2 %v105_v2, %s133_s14  ;;  %s135_s20 = smov 96   ;;  %v106_v5 = vld [vmem:[%s207_s0 + $0xa] sm:$0x1]   ;;  %s136_s23 = smov 80   ;;  %v107_v6 = vld [vmem:[%s207_s0 + $0x9] sm:$0x1]  }
   0x4   :  { %v108_v7 = vld [vmem:[%s207_s0 + $0x8] sm:$0x1]   ;;  %s137_s28 = smov 72   ;;  %s138_s29 = smov 64   ;;  %v109_v8 = vld [vmem:[%s207_s0 + $0x7] sm:$0x1]  }
   0x5   :  { %s139_s3 = smov 56   ;;  %v110_v9 = vld [vmem:[%s207_s0 + $0x6] sm:$0x1]   ;;  %v111_v10 = vld [vmem:[%s207_s0 + $0x5] sm:$0x1]   ;;  %s140_s8 = smov 48  }
   0x6   :  { %s141_s9 = smov 40   ;;  %v112_v11 = vld [vmem:[%s207_s0 + $0x4] sm:$0x1]   ;;  %s142_s12 = smov 32   ;;  %v113_v12 = vld [vmem:[%s207_s0 + $0x3] sm:$0x1]  }
   0x7   :  { %v114_v13 = vld [vmem:[%s207_s0 + $0x2] sm:$0x1]   ;;  %s143_s17 = smov 24   ;;  %s144_s18 = smov 16   ;;  %v115_v14 = vld [vmem:[%s207_s0 + $0x1] sm:$0x1]  }
   0x8   :  { %s145_s21 = smov 8   ;;  %v2_v15 = vld [vmem:[%s207_s0] sm:$0x1]   ;;  %vm27_vm4 = vcmask 851712   ;;  %vm33_vm5 = vcmask 786112   ;;  %vm39_vm6 = vcmask 720512  }
   0x9   :  { %4 = vst.msk [vmem:[#allocation0] sm:$0x1] %vm3_vm0, %v2_v15   ;;  %vm45_vm7 = vcmask 654912   ;;  %vm51_vm8 = vcmask 589312   ;;  %vm57_vm9 = vcmask 523712   ;;  %vm63_vm10 = vcmask 458112  }
   0xa   :  { %13 = vrot.lane.b32.xlu0 %v102_v3, %s134_s19  ;;  %25 = vrot.lane.b32.xlu1 %v104_v4, %s135_s20  ;;  %vm69_vm11 = vcmask 392512   ;;  %vm75_vm12 = vcmask 326912   ;;  %vm81_vm13 = vcmask 261312   ;;  %vm87_vm14 = vcmask 195712  }
   0xb   :  { %37 = vrot.lane.b32.xlu2 %v106_v5, %s136_s23  ;;  %vm93_vm15 = vcmask 130112  }
  0x12   :  { %43 = vrot.lane.b32.xlu0 %v107_v6, %s137_s28  ;;  %49 = vrot.lane.b32.xlu1 %v108_v7, %s138_s29 }
  0x13   :  { %55 = vrot.lane.b32.xlu2 %v109_v8, %s139_s3 }
  0x1a   :  { %61 = vrot.lane.b32.xlu0 %v110_v9, %s140_s8  ;;  %67 = vrot.lane.b32.xlu1 %v111_v10, %s141_s9 }
  0x1b   :  { %73 = vrot.lane.b32.xlu2 %v112_v11, %s142_s12 }
  0x22   :  { %79 = vrot.lane.b32.xlu0 %v113_v12, %s143_s17  ;;  %85 = vrot.lane.b32.xlu1 %v114_v13, %s144_s18 }
  0x23   :  { %91 = vrot.lane.b32.xlu2 %v115_v14, %s145_s21 }
  0x5d   :  { %v32_v16 = vpop.permute.xlu2 %31  }
  0x65   :  { %v38_v17 = vpop.permute.xlu2 %37  }
  0x6d   :  { %v56_v18 = vpop.permute.xlu2 %55  }
  0x74   :  { %v8_v19 = vpop.permute.xlu0 %7   ;;  %v20_v20 = vpop.permute.xlu1 %19  }
  0x75   :  { %10 = vst.msk [vmem:[#allocation0] sm:$0x1] %vm9_vm1, %v8_v19   ;;  %v74_v21 = vpop.permute.xlu2 %73  }
  0x7c   :  { %v14_v22 = vpop.permute.xlu0 %13   ;;  %v26_v23 = vpop.permute.xlu1 %25  }
  0x7d   :  { %16 = vst.msk [vmem:[#allocation0] sm:$0x1] %vm15_vm2, %v14_v22   ;;  %v92_v24 = vpop.permute.xlu2 %91  }
  0x7e   :  { %22 = vst.msk [vmem:[#allocation0] sm:$0x1] %vm21_vm3, %v20_v20  }
  0x7f   :  { %28 = vst.msk [vmem:[#allocation0] sm:$0x1] %vm27_vm4, %v26_v23  }
  0x80   :  { %34 = vst.msk [vmem:[#allocation0] sm:$0x1] %vm33_vm5, %v32_v16  }
  0x81   :  { %40 = vst.msk [vmem:[#allocation0] sm:$0x1] %vm39_vm6, %v38_v17  }
  0x84   :  { %v44_v25 = vpop.permute.xlu0 %43   ;;  %v50_v26 = vpop.permute.xlu1 %49  }
  0x85   :  { %46 = vst.msk [vmem:[#allocation0] sm:$0x1] %vm45_vm7, %v44_v25  }
  0x86   :  { %52 = vst.msk [vmem:[#allocation0] sm:$0x1] %vm51_vm8, %v50_v26  }
  0x87   :  { %58 = vst.msk [vmem:[#allocation0] sm:$0x1] %vm57_vm9, %v56_v18  }
  0x8c   :  { %v62_v27 = vpop.permute.xlu0 %61   ;;  %v68_v28 = vpop.permute.xlu1 %67  }
  0x8d   :  { %64 = vst.msk [vmem:[#allocation0] sm:$0x1] %vm63_vm10, %v62_v27  }
  0x8e   :  { %70 = vst.msk [vmem:[#allocation0] sm:$0x1] %vm69_vm11, %v68_v28  }
  0x8f   :  { %76 = vst.msk [vmem:[#allocation0] sm:$0x1] %vm75_vm12, %v74_v21  }
  0x94   :  { %v80_v29 = vpop.permute.xlu0 %79   ;;  %v86_v30 = vpop.permute.xlu1 %85  }
  0x95   :  { %82 = vst.msk [vmem:[#allocation0] sm:$0x1] %vm81_vm13, %v80_v29  }
  0x96   :  { %88 = vst.msk [vmem:[#allocation0] sm:$0x1] %vm87_vm14, %v86_v30  }
  0x97   :  { %94 = vst.msk [vmem:[#allocation0] sm:$0x1] %vm93_vm15, %v92_v24  }
  0x9e   :  { %v97_v31 = vld [vmem:[#allocation0] sm:$0x1] }
  0x9f   :  { %100 = vst [vmem:[%s208_s1] sm:$0x1] %v97_v31 }

// kernel: conv2_forward.4
= control target key start
LH: loop header
LB: loop body
LE: loop exit
PB: predicated region body
PF: predicated region fallthrough
CT: control target
= control target key end

     0   :  { %v621_v3 = vmov 0.0   ;;  %vm296_vm0 = vcmask 1046528   ;;  %vm107_vm1 = vsmask.f32 7424  ;;  %vm408_vm2 = vcmask 1045504   ;;  %s765_s1 = inlined_call_operand.vmem [shape: bf16[3,128,128], index: 1, kind: input, shape index: {}]   ;;  %s766_s0 = inlined_call_operand.vmem [shape: f32[2,16,128], index: 0, kind: input, shape index: {}]   ;;  %s767_s2 = inlined_call_operand.vmem [shape: f32[1,128], index: 2, kind: input, shape index: {}]   ;;  %s768_s3 = inlined_call_operand.vmem [shape: f32[1,128], index: 3, kind: input, shape index: {}]   ;;  %s769_s4 = inlined_call_operand.vmem [shape: f32[2,16,128], index: 4, kind: output, shape index: {0}]   ;;  %s770_s5 = inlined_call_operand.vmem [shape: f32[1,2,128], index: 5, kind: output, shape index: {1}]  }
   0x1   :  { %v601_v0 = vld [vmem:[%s765_s1 + $0x78] sm:$0xff]  ;;  %43 = vst [vmem:[#allocation2] sm:$0x1] %v621_v3  ;;  %v600_v4 = vld [vmem:[%s765_s1 + $0x70] sm:$0xff]  ;;  %v599_v7 = vld [vmem:[%s765_s1 + $0x68] sm:$0xff] }
   0x2   :  { %v593_v1 = vld [vmem:[%s765_s1 + $0x38] sm:$0xff]  ;;  %44 = vst [vmem:[#allocation2 + $0x11] sm:$0x1] %v621_v3  ;;  %182 = vmatpush.bf16.msra.mxu0 %v601_v0  ;;  %v592_v5 = vld [vmem:[%s765_s1 + $0x30] sm:$0xff]  ;;  %610 = vmatpush.bf16.msra.mxu3 %v601_v0  ;;  %v591_v8 = vld [vmem:[%s765_s1 + $0x28] sm:$0xff] }
   0x3   :  { %v609_v2 = vld [vmem:[%s765_s1 + $0xb8] sm:$0xff]  ;;  %256 = vmatpush.bf16.msra.mxu1 %v593_v1  ;;  %47 = vst [vmem:[#allocation2 + $0x12] sm:$0x1] %v621_v3  ;;  %v608_v6 = vld [vmem:[%s765_s1 + $0xb0] sm:$0xff]  ;;  %v607_v9 = vld [vmem:[%s765_s1 + $0xa8] sm:$0xff] }
   0x4   :  { %353 = vmatpush.bf16.msra.mxu2 %v609_v2  ;;  %48 = vst [vmem:[#allocation2 + $0x23] sm:$0x1] %v621_v3  ;;  %v598_v10 = vld [vmem:[%s765_s1 + $0x60] sm:$0xff]  ;;  %v20_v12 = vld [vmem:[%s766_s0 + $0x8] sm:$0xff]  ;;  %v21_v13 = vld [vmem:[%s766_s0 + $0x10] sm:$0xff] }
   0x5   :  { %v19_v11 = vld [vmem:[%s766_s0] sm:$0xff]  ;;  %v22_v14 = vld [vmem:[%s766_s0 + $0x18] sm:$0xff]  ;;  %v596_v34 = vld [vmem:[%s765_s1 + $0x50] sm:$0xff] }
   0x6   :  { %183 = vmatpush.bf16.msra.mxu0 %v600_v4  ;;  %611 = vmatpush.bf16.msra.mxu3 %v600_v4  ;;  %v619_v15 = vld [vmem:[%s767_s2] ss:$0 sm:$0xff]  ;;  %v597_v26 = vld [vmem:[%s765_s1 + $0x58] sm:$0xff]  ;;  %v588_v35 = vld [vmem:[%s765_s1 + $0x10] sm:$0xff] }
   0x7   :  { %257 = vmatpush.bf16.msra.mxu1 %v592_v5  ;;  %v590_v16 = vld [vmem:[%s765_s1 + $0x20] sm:$0xff]  ;;  %v27_v19 = vmul.f32 %v619_v15, %v19_v11  ;;  %v28_v20 = vmul.f32 %v619_v15, %v20_v12  ;;  %v29_v21 = vmul.f32 %v619_v15, %v21_v13  ;;  %v30_v22 = vmul.f32 %v619_v15, %v22_v14  ;;  %v589_v27 = vld [vmem:[%s765_s1 + $0x18] sm:$0xff]  ;;  %v604_v36 = vld [vmem:[%s765_s1 + $0x90] sm:$0xff] }
   0x8   :  { %354 = vmatpush.bf16.msra.mxu2 %v608_v6  ;;  %v620_v17 = vld [vmem:[%s768_s3] ss:$0 sm:$0xff]  ;;  %v605_v29 = vld [vmem:[%s765_s1 + $0x98] sm:$0xff]  ;;  %v595_v37 = vld [vmem:[%s765_s1 + $0x48] sm:$0xff] }
   0x9   :  { %v606_v18 = vld [vmem:[%s765_s1 + $0xa0] sm:$0xff]  ;;  %v35_v23 = vadd.f32 %v620_v17, %v27_v19  ;;  %v36_v24 = vadd.f32 %v620_v17, %v28_v20  ;;  %v37_v25 = vadd.f32 %v620_v17, %v29_v21  ;;  %v38_v28 = vadd.f32 %v620_v17, %v30_v22  ;;  %v587_v38 = vld [vmem:[%s765_s1 + $0x8] sm:$0xff] }
   0xa   :  { %184 = vmatpush.bf16.msra.mxu0 %v599_v7  ;;  %612 = vmatpush.bf16.msra.mxu3 %v599_v7  ;;  %v603_v39 = vld [vmem:[%s765_s1 + $0x88] sm:$0xff]  ;;  %v594_v43 = vld [vmem:[%s765_s1 + $0x40] sm:$0xff] }
   0xb   :  { %258 = vmatpush.bf16.msra.mxu1 %v591_v8  ;;  %v39_v30 = vmax.f32 %v35_v23, 0.0  ;;  %v40_v31 = vmax.f32 %v36_v24, 0.0  ;;  %v41_v32 = vmax.f32 %v37_v25, 0.0  ;;  %v42_v33 = vmax.f32 %v38_v28, 0.0  ;;  %v586_v44 = vld [vmem:[%s765_s1] sm:$0xff] }
   0xc   :  { %355 = vmatpush.bf16.msra.mxu2 %v607_v9  ;;  %v602_v47 = vld [vmem:[%s765_s1 + $0x80] sm:$0xff] }
   0xd   :  { %45 = vst [vmem:[#allocation2 + $0x1] sm:$0xff] %v39_v30 }
   0xe   :  { %185 = vmatpush.bf16.msra.mxu0 %v598_v10  ;;  %613 = vmatpush.bf16.msra.mxu3 %v598_v10  ;;  %46 = vst [vmem:[#allocation2 + $0x9] sm:$0xff] %v40_v31 }
   0xf   :  { %259 = vmatpush.bf16.msra.mxu1 %v590_v16  ;;  %49 = vst [vmem:[#allocation2 + $0x13] sm:$0xff] %v41_v32 }
  0x10   :  { %356 = vmatpush.bf16.msra.mxu2 %v606_v18  ;;  %50 = vst [vmem:[#allocation2 + $0x1b] sm:$0xff] %v42_v33 }
  0x12   :  { %186 = vmatpush.bf16.msra.mxu0 %v597_v26  ;;  %614 = vmatpush.bf16.msra.mxu3 %v597_v26 }
  0x13   :  { %260 = vmatpush.bf16.msra.mxu1 %v589_v27 }
  0x14   :  { %357 = vmatpush.bf16.msra.mxu2 %v605_v29  ;;  %v51_v40 = vld [vmem:[#allocation2] sm:$0xff] }
  0x15   :  { %v52_v41 = vld [vmem:[#allocation2 + $0x8] sm:$0xff]  ;;  %v56_v42 = vpack.c.bf16 %v51_v40, %v51_v40 }
  0x16   :  { %187 = vmatpush.bf16.msra.mxu0 %v596_v34  ;;  %615 = vmatpush.bf16.msra.mxu3 %v596_v34  ;;  %v53_v45 = vld [vmem:[#allocation2 + $0x10] sm:$0xff]  ;;  %v57_v46 = vpack.c.bf16 %v52_v41, %v52_v41 }
  0x17   :  { %261 = vmatpush.bf16.msra.mxu1 %v588_v35  ;;  %v54_v48 = vld [vmem:[#allocation2 + $0x18] sm:$0xff]  ;;  %v58_v49 = vpack.c.bf16 %v53_v45, %v53_v45  ;;  %v99_v50 = vunpack.c.l.b16 %v56_v42  ;;  %v55_v51 = vld [vmem:[#allocation2 + $0x20] sm:$0xf] }
  0x18   :  { %358 = vmatpush.bf16.msra.mxu2 %v604_v36  ;;  %v59_v52 = vpack.c.bf16 %v54_v48, %v54_v48  ;;  %v100_v53 = vunpack.c.l.b16 %v57_v46  ;;  %v60_v54 = vpack.c.bf16 %v55_v51, %v55_v51 }
  0x19   :  { %v101_v55 = vunpack.c.l.b16 %v58_v49 }
  0x1a   :  { %188 = vmatpush.bf16.msra.mxu0 %v595_v37  ;;  %616 = vmatpush.bf16.msra.mxu3 %v595_v37  ;;  %v102_v56 = vunpack.c.l.b16 %v59_v52  ;;  %v104_v57 = vpack.c.b16 %v100_v53, %v99_v50  ;;  %v103_v58 = vunpack.c.l.b16 %v60_v54 }
  0x1b   :  { %262 = vmatpush.bf16.msra.mxu1 %v587_v38 }
  0x1c   :  { %359 = vmatpush.bf16.msra.mxu2 %v603_v39  ;;  %v105_v59 = vpack.c.b16 %v102_v56, %v101_v55  ;;  %v109_v60 = vshrl.u32 %v104_v57, 16  ;;  %v111_v61 = vshll.u32 %v104_v57, 16  ;;  %v297_v62 = vrot.slane %v104_v57, 1 }
  0x1d   :  { %v106_v63 = vpack.c.b16 %v103_v58, %v103_v58 }
  0x1e   :  { %189 = vmatpush.bf16.msra.mxu0 %v594_v43  ;;  %617 = vmatpush.bf16.msra.mxu3 %v594_v43  ;;  %v113_v0 = vrot.slane %v111_v61, 1  ;;  %v116_v1 = vshll.u32 %v105_v59, 16  ;;  %v298_v2 = vrot.slane %v105_v59, 1  ;;  %v120_v3 = vshrl.u32 %v105_v59, 16 }
  0x1f   :  { %263 = vmatpush.bf16.msra.mxu1 %v586_v44  ;;  %v124_v4 = vshll.u32 %v106_v63, 16  ;;  %v300_v12 = vrot.slane %v106_v63, 1  ;;  %v128_v13 = vshrl.u32 %v106_v63, 16 }
  0x20   :  { %360 = vmatpush.bf16.msra.mxu2 %v602_v47  ;;  %v114_v5 = vor.u32 %v113_v0, %v109_v60  ;;  %v118_v6 = vrot.slane %v116_v1, 1  ;;  %v299_v7 = vsel %vm296_vm0, %v297_v62, %v298_v2 }
  0x21   :  { %v126_v8 = vrot.slane %v124_v4, 1  ;;  %v301_v14 = vsel %vm296_vm0, %v298_v2, %v300_v12 }
  0x22   :  { %264 = vmatmul.bf16.vlgmr.msra.gmra.mxu1 %v104_v57  ;;  %v119_v9 = vsel %vm107_vm1, %v114_v5, %v118_v6  ;;  %v122_v10 = vor.u32 %v120_v3, %v118_v6 }
  0x23   :  { %361 = vmatmul.bf16.vlgmr.msra.gmra.mxu2 %v299_v7  ;;  %190 = vmatmul.bf16.vlgmr.msra.gmra.mxu0 %v119_v9  ;;  %v130_v15 = vor.u32 %v128_v13, %v126_v8 }
  0x24   :  { %v127_v11 = vsel %vm107_vm1, %v122_v10, %v126_v8 }
  0x25   :  { %195 = vmatmul.bf16.vlgmr.msra.gmra.mxu3 %v127_v11 }
  0x32   :  { %269 = vmatmul.bf16.gmra.mxu1 %v105_v59 }
  0x33   :  { %366 = vmatmul.bf16.gmra.mxu2 %v301_v14 }
  0x35   :  { %200 = vmatmul.bf16.gmra.mxu3 %v130_v15 }
  0x42   :  { %274 = vmatmul.bf16.gmra.mxu1 %v106_v63 }
  0x43   :  { %371 = vmatmul.bf16.gmra.mxu2 %v300_v12 }
  0x9f   :  { %v265_v16 = vpop.f32.mrf.mxu1 }
  0xa0   :  { %v191_v17 = vpop.f32.mrf.mxu0 }
  0xa1   :  { %v266_v18 = vadd.f32 %v265_v16, %v191_v17 }
  0xa6   :  { %v362_v20 = vpop.f32.mrf.mxu2 }
  0xa7   :  { %v267_v19 = vpop.f32.mrf.mxu1  ;;  %v376_v21 = vadd.f32 %v362_v20, %v266_v18 }
  0xa8   :  { %v193_v22 = vpop.f32.mrf.mxu0  ;;  %v196_v23 = vpop.f32.mrf.mxu3 }
  0xa9   :  { %381 = vst [vmem:[%s769_s4] sm:$0xff] %v376_v21  ;;  %v268_v25 = vadd.f32 %v267_v19, %v193_v22  ;;  %v391_v39 = vmul.f32 %v376_v21, %v376_v21 }
  0xae   :  { %v364_v26 = vpop.f32.mrf.mxu2 }
  0xaf   :  { %v270_v24 = vpop.f32.mrf.mxu1  ;;  %v377_v27 = vadd.f32 %v364_v26, %v268_v25 }
  0xb0   :  { %v198_v28 = vpop.f32.mrf.mxu3  ;;  %v271_v29 = vadd.f32 %v270_v24, %v196_v23 }
  0xb1   :  { %382 = vst [vmem:[%s769_s4 + $0x8] sm:$0xff] %v377_v27  ;;  %v392_v36 = vmul.f32 %v377_v27, %v377_v27  ;;  %v383_v40 = vadd.f32 %v377_v27, %v376_v21 }
  0xb3   :  { %v393_v41 = vadd.f32 %v392_v36, %v391_v39  ;;  %v384_v44 = vrot.slane %v383_v40, 4 }
  0xb5   :  { %v394_v47 = vrot.slane %v393_v41, 4  ;;  %v385_v52 = vadd.f32 %v384_v44, %v383_v40 }
  0xb6   :  { %v367_v31 = vpop.f32.mrf.mxu2 }
  0xb7   :  { %v272_v30 = vpop.f32.mrf.mxu1  ;;  %v378_v32 = vadd.f32 %v367_v31, %v271_v29  ;;  %v395_v57 = vadd.f32 %v394_v47, %v393_v41  ;;  %v386_v62 = vrot.slane %v385_v52, 2 }
  0xb8   :  { %v201_v33 = vpop.f32.mrf.mxu3  ;;  %v273_v35 = vadd.f32 %v272_v30, %v198_v28 }
  0xb9   :  { %583 = vst [vmem:[%s769_s4 + $0xe] sm:$0xfc] %v378_v32  ;;  %v424_v49 = vmul.f32 %v378_v32, %v378_v32  ;;  %v409_v53 = vrot.slane %v378_v32, 2  ;;  %v396_v2 = vrot.slane %v395_v57, 2  ;;  %v387_v6 = vadd.f32 %v386_v62, %v385_v52 }
  0xbb   :  { %v430_v58 = vrot.slane %v424_v49, 2  ;;  %v397_v9 = vadd.f32 %v396_v2, %v395_v57  ;;  %v388_v12 = vrot.slane %v387_v6, 1 }
  0xbd   :  { %v398_v15 = vrot.slane %v397_v9, 1  ;;  %v389_v18 = vadd.f32 %v388_v12, %v387_v6 }
  0xbe   :  { %v369_v37 = vpop.f32.mrf.mxu2 }
  0xbf   :  { %v275_v34 = vpop.f32.mrf.mxu1  ;;  %v379_v38 = vadd.f32 %v369_v37, %v273_v35  ;;  %v399_v21 = vadd.f32 %v398_v15, %v397_v9 }
  0xc0   :  { %v203_v42 = vpop.f32.mrf.mxu3  ;;  %v276_v43 = vadd.f32 %v275_v34, %v201_v33 }
  0xc1   :  { %584 = vst [vmem:[%s769_s4 + $0x16] sm:$0xff] %v379_v38  ;;  %v425_v46 = vmul.f32 %v379_v38, %v379_v38  ;;  %v410_v50 = vrot.slane %v379_v38, 2 }
  0xc3   :  { %v431_v54 = vrot.slane %v425_v46, 2  ;;  %v411_v59 = vsel %vm408_vm2, %v409_v53, %v410_v50 }
  0xc5   :  { %v432_v0 = vsel %vm408_vm2, %v430_v58, %v431_v54 }
  0xc6   :  { %v372_v48 = vpop.f32.mrf.mxu2 }
  0xc7   :  { %v277_v45 = vpop.f32.mrf.mxu1  ;;  %v380_v51 = vadd.f32 %v372_v48, %v276_v43 }
  0xc9   :  { %585 = vst [vmem:[%s769_s4 + $0x1e] sm:$0x3] %v380_v51  ;;  %v412_v55 = vrot.slane %v380_v51, 2  ;;  %v426_v56 = vmul.f32 %v380_v51, %v380_v51 }
  0xcb   :  { %v413_v60 = vsel %vm408_vm2, %v410_v50, %v412_v55  ;;  %v433_v61 = vrot.slane %v426_v56, 2 }
  0xcc   :  { %v416_v63 = vadd.f32 %v413_v60, %v411_v59 }
  0xcd   :  { %v434_v1 = vsel %vm408_vm2, %v431_v54, %v433_v61 }
  0xce   :  { %v417_v3 = vrot.slane %v416_v63, 4  ;;  %v437_v4 = vadd.f32 %v434_v1, %v432_v0  ;;  %v374_v5 = vpop.f32.mrf.mxu2 }
  0xd0   :  { %v418_v7 = vadd.f32 %v417_v3, %v416_v63  ;;  %v438_v8 = vrot.slane %v437_v4, 4 }
  0xd2   :  { %v419_v10 = vrot.slane %v418_v7, 2  ;;  %v439_v11 = vadd.f32 %v438_v8, %v437_v4 }
  0xd4   :  { %v420_v13 = vadd.f32 %v419_v10, %v418_v7  ;;  %v440_v14 = vrot.slane %v439_v11, 2 }
  0xd6   :  { %v421_v16 = vrot.slane %v420_v13, 1  ;;  %v441_v17 = vadd.f32 %v440_v14, %v439_v11 }
  0xd8   :  { %v422_v19 = vadd.f32 %v421_v16, %v420_v13  ;;  %v442_v20 = vrot.slane %v441_v17, 1 }
  0xda   :  { %v423_v22 = vadd.f32 %v422_v19, %v389_v18  ;;  %v443_v23 = vadd.f32 %v442_v20, %v441_v17 }
  0xdc   :  { %v444_v24 = vadd.f32 %v443_v23, %v399_v21  ;;  %445 = vst [vmem:[%s770_s5] sm:$0x1] %v423_v22 }
  0xde   :  { %446 = vst [vmem:[%s770_s5 + $0x1] sm:$0x1] %v444_v24 }

// kernel: conv2_forward.5
= control target key start
LH: loop header
LB: loop body
LE: loop exit
PB: predicated region body
PF: predicated region fallthrough
CT: control target
= control target key end

     0   :  { %s98_s0 = inlined_call_operand.vmem [shape: f32[32,128], index: 0, kind: input, shape index: {}, may-alias: {0,3}]   ;;  %s99_s1 = inlined_call_operand.vmem [shape: f32[1,128], index: 1, kind: input, shape index: {}]   ;;  %s100_s2 = inlined_call_operand.vmem [shape: f32[1,128], index: 2, kind: input, shape index: {}]   ;;  %s101_s3 = inlined_call_operand.vmem [shape: f32[32,128], index: 3, kind: output, shape index: {}, may-alias: {0,3}]  }
   0x1   :  { %v14_v0 = vld [vmem:[%s98_s0] sm:$0xff]  ;;  %v15_v3 = vld [vmem:[%s98_s0 + $0x8] sm:$0xff]  ;;  %v16_v6 = vld [vmem:[%s98_s0 + $0x10] sm:$0xff] }
   0x2   :  { %v46_v1 = vld [vmem:[%s99_s1] ss:$0 sm:$0xff]  ;;  %v17_v7 = vld [vmem:[%s98_s0 + $0x18] sm:$0xff] }
   0x3   :  { %v47_v2 = vld [vmem:[%s100_s2] ss:$0 sm:$0xff]  ;;  %v22_v4 = vmul.f32 %v46_v1, %v14_v0  ;;  %v23_v5 = vmul.f32 %v46_v1, %v15_v3  ;;  %v24_v8 = vmul.f32 %v46_v1, %v16_v6  ;;  %v25_v9 = vmul.f32 %v46_v1, %v17_v7 }
   0x5   :  { %v30_v10 = vadd.f32 %v47_v2, %v22_v4  ;;  %v31_v11 = vadd.f32 %v47_v2, %v23_v5  ;;  %v32_v12 = vadd.f32 %v47_v2, %v24_v8  ;;  %v33_v13 = vadd.f32 %v47_v2, %v25_v9 }
   0x7   :  { %v34_v14 = vmax.f32 %v30_v10, 0.0  ;;  %v35_v15 = vmax.f32 %v31_v11, 0.0  ;;  %v36_v16 = vmax.f32 %v32_v12, 0.0  ;;  %v37_v17 = vmax.f32 %v33_v13, 0.0 }
   0x9   :  { %38 = vst [vmem:[%s101_s3] sm:$0xff] %v34_v14 }
   0xa   :  { %39 = vst [vmem:[%s101_s3 + $0x8] sm:$0xff] %v35_v15 }
   0xb   :  { %40 = vst [vmem:[%s101_s3 + $0x10] sm:$0xff] %v36_v16 }
   0xc   :  { %41 = vst [vmem:[%s101_s3 + $0x18] sm:$0xff] %v37_v17 }

</bundles_post_ra>
